<compile_context>
chip_gen: v5e
topology: v5e:2x2
jax: 0.10.0
libtpu: 0.0.40
codegen_flags: <defaults>
</compile_context>

<pallas_src>
import functools

import jax
import jax.numpy as jnp
from jax.experimental import pallas as pl
from jax.experimental.pallas import tpu as pltpu

D_IN = 784          # 28*28
D_IN_PAD = 896      # 7*128: lane-dense K for W1 and N for W8 / decoded store
ENC_DIM = 3
ENC_PAD = 128       # lane-dense encoded output (true width 3)


# ----------------------------- Pallas kernel ---------------------------------
def autoencoder_kernel(
    x_ref,
    w1_ref, b1_ref, w2_ref, b2_ref, w3_ref, b3_ref, w4_ref, b4_ref,   # encoder
    w5_ref, b5_ref, w6_ref, b6_ref, w7_ref, b7_ref, w8_ref, b8_ref,   # decoder
    enc_ref, dec_ref,
):
    x = x_ref[...]

    def linear(h, w_ref, b_ref):
        return jnp.dot(h, w_ref[...], preferred_element_type=jnp.float32) + b_ref[...]

    # Encoder: Linear+Tanh x3, then Linear (no activation).
    h = jnp.tanh(linear(x, w1_ref, b1_ref))
    h = jnp.tanh(linear(h, w2_ref, b2_ref))
    h = jnp.tanh(linear(h, w3_ref, b3_ref))
    encoded = linear(h, w4_ref, b4_ref)          # (TB, 128); cols >= 3 are exactly 0

    # Decoder: Linear+Tanh x3, then Linear + Sigmoid.
    d = jnp.tanh(linear(encoded, w5_ref, b5_ref))  # W5 has zero rows for the padded cols
    d = jnp.tanh(linear(d, w6_ref, b6_ref))
    d = jnp.tanh(linear(d, w7_ref, b7_ref))
    decoded = jax.nn.sigmoid(linear(d, w8_ref, b8_ref))  # (TB, 896); cols >= 784 sliced away

    enc_ref[...] = encoded.astype(enc_ref.dtype)
    dec_ref[...] = decoded.astype(dec_ref.dtype)


# ----------------------------- wrapper ----------------------------------------
def _pad_params(params):
    """Zero-pad W1(K), W4(N)+b4, W5(K), W8(N)+b8 to lane-multiples. Exact math."""
    (w1, b1, w2, b2, w3, b3, w4, b4, w5, b5, w6, b6, w7, b7, w8, b8) = params
    w1p = jnp.pad(w1, ((0, D_IN_PAD - D_IN), (0, 0)))
    w4p = jnp.pad(w4, ((0, 0), (0, ENC_PAD - ENC_DIM)))
    b4p = jnp.pad(b4, ((0, 0), (0, ENC_PAD - ENC_DIM)))
    w5p = jnp.pad(w5, ((0, ENC_PAD - ENC_DIM), (0, 0)))
    w8p = jnp.pad(w8, ((0, 0), (0, D_IN_PAD - D_IN)))
    b8p = jnp.pad(b8, ((0, 0), (0, D_IN_PAD - D_IN)))
    return [w1p, b1, w2, b2, w3, b3, w4p, b4p, w5p, b5, w6, b6, w7, b7, w8p, b8p]


def _choose_tile(batch):
    if batch >= 256:
        return 256                      # fills the 256-wide MXU M dim on v6e/v7x
    return max(8, ((batch + 7) // 8) * 8)


@functools.partial(jax.jit, static_argnames=())
def autoencoder_forward(x, params):
    """x: (B, 784) f32. params: flat list [w1,b1,...,w8,b8] in (in,out) layout.
    Returns (encoded (B,3), decoded (B,784))."""
    B = x.shape[0]
    TB = _choose_tile(B)
    B_pad = ((B + TB - 1) // TB) * TB
    num_tiles = B_pad // TB

    x_p = jnp.pad(x.astype(jnp.float32), ((0, B_pad - B), (0, D_IN_PAD - D_IN)))
    params_p = _pad_params(params)

    tile_io = lambda width: pl.BlockSpec((TB, width), lambda i: (i, 0))
    const_spec = lambda shape: pl.BlockSpec(shape, lambda i: (0, 0))

    in_specs = [tile_io(D_IN_PAD)] + [const_spec(p.shape) for p in params_p]
    out_specs = (tile_io(ENC_PAD), tile_io(D_IN_PAD))

    # Advisory cost estimate for XLA scheduling around the custom call.
    layer_dims = [(D_IN_PAD, 128), (128, 64), (64, 12), (12, ENC_PAD),
                  (ENC_PAD, 12), (12, 64), (64, 128), (128, D_IN_PAD)]
    flops = 2 * B_pad * sum(k * n for k, n in layer_dims)
    transcendentals = B_pad * (128 + 64 + 12 + 12 + 64 + 128 + D_IN_PAD)
    weight_bytes = sum(int(p.size) * 4 for p in params_p)
    bytes_accessed = B_pad * 4 * (2 * D_IN_PAD + ENC_PAD) + weight_bytes

    enc_p, dec_p = pl.pallas_call(
        autoencoder_kernel,
        out_shape=(
            jax.ShapeDtypeStruct((B_pad, ENC_PAD), jnp.float32),
            jax.ShapeDtypeStruct((B_pad, D_IN_PAD), jnp.float32),
        ),
        grid=(num_tiles,),
        in_specs=in_specs,
        out_specs=out_specs,
        compiler_params=pltpu.CompilerParams(
            dimension_semantics=("parallel",),
        ),
        cost_estimate=pl.CostEstimate(
            flops=flops,
            transcendentals=transcendentals,
            bytes_accessed=bytes_accessed,
        ),
    )(x_p, *params_p)

    return enc_p[:B, :ENC_DIM], dec_p[:B, :D_IN]


# --------------------------- parameter creation -------------------------------
def make_params(key):
    dims = [(784, 128), (128, 64), (64, 12), (12, 3),     # encoder
            (3, 12), (12, 64), (64, 128), (128, 784)]     # decoder
    params = []
    for (fan_in, fan_out) in dims:
        key, kw, kb = jax.random.split(key, 3)
        bound = 1.0 / (fan_in ** 0.5)                      # PyTorch Linear default init range
        w = jax.random.uniform(kw, (fan_in, fan_out), jnp.float32, -bound, bound)
        b = jax.random.uniform(kb, (1, fan_out), jnp.float32, -bound, bound)
        params += [w, b]
    return params


# ------------------------------ reference -------------------------------------
def reference_forward(x, params):
    h = x
    for i in range(0, 8, 2):       # encoder
        h = h @ params[i] + params[i + 1]
        if i < 6:
            h = jnp.tanh(h)
    encoded = h
    d = encoded
    for i in range(8, 16, 2):      # decoder
        d = d @ params[i] + params[i + 1]
        d = jnp.tanh(d) if i < 14 else jax.nn.sigmoid(d)
    return encoded, d


if __name__ == "__main__":
    key = jax.random.PRNGKey(0)
    kx, kp, kx2 = jax.random.split(key, 3)
    params = make_params(kp)

    # Small test (single tile).
    B = 8
    x = jax.random.normal(kx, (B, 784), jnp.float32)
    encoded, decoded = autoencoder_forward(x, params)
    jax.block_until_ready((encoded, decoded))
    enc_ref, dec_ref = reference_forward(x, params)
    assert encoded.shape == (B, 3) and decoded.shape == (B, 784)
    assert jnp.allclose(encoded, enc_ref, atol=1e-4, rtol=1e-4)
    assert jnp.allclose(decoded, dec_ref, atol=1e-4, rtol=1e-4)

    # Multi-tile test (exercises the batch grid + resident weights + batch padding).
    B2 = 300
    x2 = jax.random.normal(kx2, (B2, 784), jnp.float32)
    encoded2, decoded2 = autoencoder_forward(x2, params)
    jax.block_until_ready((encoded2, decoded2))
    enc_ref2, dec_ref2 = reference_forward(x2, params)
    assert encoded2.shape == (B2, 3) and decoded2.shape == (B2, 784)
    assert jnp.allclose(encoded2, enc_ref2, atol=1e-4, rtol=1e-4)
    assert jnp.allclose(decoded2, dec_ref2, atol=1e-4, rtol=1e-4)

    print("KERNEL_OK")
</pallas_src>

<mosaic_0001>
module attributes {stable_mosaic.version = 11 : i64} {
  func.func @autoencoder_kernel(%arg0: i32, %arg1: memref<8x896xf32, #tpu.memory_space<vmem>>, %arg2: memref<896x128xf32, #tpu.memory_space<vmem>>, %arg3: memref<1x128xf32, #tpu.memory_space<vmem>>, %arg4: memref<128x64xf32, #tpu.memory_space<vmem>>, %arg5: memref<1x64xf32, #tpu.memory_space<vmem>>, %arg6: memref<64x12xf32, #tpu.memory_space<vmem>>, %arg7: memref<1x12xf32, #tpu.memory_space<vmem>>, %arg8: memref<12x128xf32, #tpu.memory_space<vmem>>, %arg9: memref<1x128xf32, #tpu.memory_space<vmem>>, %arg10: memref<128x12xf32, #tpu.memory_space<vmem>>, %arg11: memref<1x12xf32, #tpu.memory_space<vmem>>, %arg12: memref<12x64xf32, #tpu.memory_space<vmem>>, %arg13: memref<1x64xf32, #tpu.memory_space<vmem>>, %arg14: memref<64x128xf32, #tpu.memory_space<vmem>>, %arg15: memref<1x128xf32, #tpu.memory_space<vmem>>, %arg16: memref<128x896xf32, #tpu.memory_space<vmem>>, %arg17: memref<1x896xf32, #tpu.memory_space<vmem>>, %arg18: memref<8x128xf32, #tpu.memory_space<vmem>>, %arg19: memref<8x896xf32, #tpu.memory_space<vmem>>) attributes {dimension_semantics = [#tpu.dimension_semantics<parallel>], iteration_bounds = array<i64: 1>, scalar_prefetch = 0 : i64, scratch_operands = 0 : i64, tpu.core_type = #tpu.core_type<tc>, window_params = [{transform_indices = @transform_0, window_bounds = array<i64: 8, 896>}, {pipeline_mode = #tpu.pipeline_mode<synchronous>, transform_indices = @transform_1, window_bounds = array<i64: 896, 128>}, {pipeline_mode = #tpu.pipeline_mode<synchronous>, transform_indices = @transform_2, window_bounds = array<i64: 1, 128>}, {pipeline_mode = #tpu.pipeline_mode<synchronous>, transform_indices = @transform_3, window_bounds = array<i64: 128, 64>}, {pipeline_mode = #tpu.pipeline_mode<synchronous>, transform_indices = @transform_4, window_bounds = array<i64: 1, 64>}, {pipeline_mode = #tpu.pipeline_mode<synchronous>, transform_indices = @transform_5, window_bounds = array<i64: 64, 12>}, {pipeline_mode = #tpu.pipeline_mode<synchronous>, transform_indices = @transform_6, window_bounds = array<i64: 1, 12>}, {pipeline_mode = #tpu.pipeline_mode<synchronous>, transform_indices = @transform_7, window_bounds = array<i64: 12, 128>}, {pipeline_mode = #tpu.pipeline_mode<synchronous>, transform_indices = @transform_8, window_bounds = array<i64: 1, 128>}, {pipeline_mode = #tpu.pipeline_mode<synchronous>, transform_indices = @transform_9, window_bounds = array<i64: 128, 12>}, {pipeline_mode = #tpu.pipeline_mode<synchronous>, transform_indices = @transform_10, window_bounds = array<i64: 1, 12>}, {pipeline_mode = #tpu.pipeline_mode<synchronous>, transform_indices = @transform_11, window_bounds = array<i64: 12, 64>}, {pipeline_mode = #tpu.pipeline_mode<synchronous>, transform_indices = @transform_12, window_bounds = array<i64: 1, 64>}, {pipeline_mode = #tpu.pipeline_mode<synchronous>, transform_indices = @transform_13, window_bounds = array<i64: 64, 128>}, {pipeline_mode = #tpu.pipeline_mode<synchronous>, transform_indices = @transform_14, window_bounds = array<i64: 1, 128>}, {pipeline_mode = #tpu.pipeline_mode<synchronous>, transform_indices = @transform_15, window_bounds = array<i64: 128, 896>}, {pipeline_mode = #tpu.pipeline_mode<synchronous>, transform_indices = @transform_16, window_bounds = array<i64: 1, 896>}, {transform_indices = @transform_17, window_bounds = array<i64: 8, 128>}, {transform_indices = @transform_18, window_bounds = array<i64: 8, 896>}]} {
    %c0 = arith.constant 0 : index
    %c0_0 = arith.constant 0 : index
    %0 = vector.load %arg1[%c0, %c0_0] : memref<8x896xf32, #tpu.memory_space<vmem>>, vector<8x896xf32>
    %c0_1 = arith.constant 0 : index
    %c0_2 = arith.constant 0 : index
    %1 = vector.load %arg2[%c0_1, %c0_2] : memref<896x128xf32, #tpu.memory_space<vmem>>, vector<896x128xf32>
    %cst = arith.constant dense<0.000000e+00> : vector<8x128xf32>
    %2 = tpu.matmul %0, %1, %cst {dimension_numbers = #tpu.dot_dimension_numbers<[1], [0], [0], [1], [0, 0, 1, 1], [], []>} : vector<8x896xf32>, vector<896x128xf32>, vector<8x128xf32> -> vector<8x128xf32>
    %c0_3 = arith.constant 0 : index
    %c0_4 = arith.constant 0 : index
    %3 = vector.load %arg3[%c0_3, %c0_4] : memref<1x128xf32, #tpu.memory_space<vmem>>, vector<1x128xf32>
    %4 = vector.broadcast %3 : vector<1x128xf32> to vector<8x128xf32>
    %5 = arith.addf %2, %4 : vector<8x128xf32>
    %6 = math.tanh %5 : vector<8x128xf32>
    %c0_5 = arith.constant 0 : index
    %c0_6 = arith.constant 0 : index
    %7 = vector.load %arg4[%c0_5, %c0_6] : memref<128x64xf32, #tpu.memory_space<vmem>>, vector<128x64xf32>
    %cst_7 = arith.constant dense<0.000000e+00> : vector<8x64xf32>
    %8 = tpu.matmul %6, %7, %cst_7 {dimension_numbers = #tpu.dot_dimension_numbers<[1], [0], [0], [1], [0, 0, 1, 1], [], []>} : vector<8x128xf32>, vector<128x64xf32>, vector<8x64xf32> -> vector<8x64xf32>
    %c0_8 = arith.constant 0 : index
    %c0_9 = arith.constant 0 : index
    %9 = vector.load %arg5[%c0_8, %c0_9] : memref<1x64xf32, #tpu.memory_space<vmem>>, vector<1x64xf32>
    %10 = vector.broadcast %9 : vector<1x64xf32> to vector<8x64xf32>
    %11 = arith.addf %8, %10 : vector<8x64xf32>
    %12 = math.tanh %11 : vector<8x64xf32>
    %c0_10 = arith.constant 0 : index
    %c0_11 = arith.constant 0 : index
    %13 = vector.load %arg6[%c0_10, %c0_11] : memref<64x12xf32, #tpu.memory_space<vmem>>, vector<64x12xf32>
    %cst_12 = arith.constant dense<0.000000e+00> : vector<8x12xf32>
    %14 = tpu.matmul %12, %13, %cst_12 {dimension_numbers = #tpu.dot_dimension_numbers<[1], [0], [0], [1], [0, 0, 1, 1], [], []>} : vector<8x64xf32>, vector<64x12xf32>, vector<8x12xf32> -> vector<8x12xf32>
    %c0_13 = arith.constant 0 : index
    %c0_14 = arith.constant 0 : index
    %15 = vector.load %arg7[%c0_13, %c0_14] : memref<1x12xf32, #tpu.memory_space<vmem>>, vector<1x12xf32>
    %16 = vector.broadcast %15 : vector<1x12xf32> to vector<8x12xf32>
    %17 = arith.addf %14, %16 : vector<8x12xf32>
    %18 = math.tanh %17 : vector<8x12xf32>
    %c0_15 = arith.constant 0 : index
    %c0_16 = arith.constant 0 : index
    %19 = vector.load %arg8[%c0_15, %c0_16] : memref<12x128xf32, #tpu.memory_space<vmem>>, vector<12x128xf32>
    %cst_17 = arith.constant dense<0.000000e+00> : vector<8x128xf32>
    %20 = tpu.matmul %18, %19, %cst_17 {dimension_numbers = #tpu.dot_dimension_numbers<[1], [0], [0], [1], [0, 0, 1, 1], [], []>} : vector<8x12xf32>, vector<12x128xf32>, vector<8x128xf32> -> vector<8x128xf32>
    %c0_18 = arith.constant 0 : index
    %c0_19 = arith.constant 0 : index
    %21 = vector.load %arg9[%c0_18, %c0_19] : memref<1x128xf32, #tpu.memory_space<vmem>>, vector<1x128xf32>
    %22 = vector.broadcast %21 : vector<1x128xf32> to vector<8x128xf32>
    %23 = arith.addf %20, %22 : vector<8x128xf32>
    %c0_20 = arith.constant 0 : index
    %c0_21 = arith.constant 0 : index
    %24 = vector.load %arg10[%c0_20, %c0_21] : memref<128x12xf32, #tpu.memory_space<vmem>>, vector<128x12xf32>
    %cst_22 = arith.constant dense<0.000000e+00> : vector<8x12xf32>
    %25 = tpu.matmul %23, %24, %cst_22 {dimension_numbers = #tpu.dot_dimension_numbers<[1], [0], [0], [1], [0, 0, 1, 1], [], []>} : vector<8x128xf32>, vector<128x12xf32>, vector<8x12xf32> -> vector<8x12xf32>
    %c0_23 = arith.constant 0 : index
    %c0_24 = arith.constant 0 : index
    %26 = vector.load %arg11[%c0_23, %c0_24] : memref<1x12xf32, #tpu.memory_space<vmem>>, vector<1x12xf32>
    %27 = vector.broadcast %26 : vector<1x12xf32> to vector<8x12xf32>
    %28 = arith.addf %25, %27 : vector<8x12xf32>
    %29 = math.tanh %28 : vector<8x12xf32>
    %c0_25 = arith.constant 0 : index
    %c0_26 = arith.constant 0 : index
    %30 = vector.load %arg12[%c0_25, %c0_26] : memref<12x64xf32, #tpu.memory_space<vmem>>, vector<12x64xf32>
    %cst_27 = arith.constant dense<0.000000e+00> : vector<8x64xf32>
    %31 = tpu.matmul %29, %30, %cst_27 {dimension_numbers = #tpu.dot_dimension_numbers<[1], [0], [0], [1], [0, 0, 1, 1], [], []>} : vector<8x12xf32>, vector<12x64xf32>, vector<8x64xf32> -> vector<8x64xf32>
    %c0_28 = arith.constant 0 : index
    %c0_29 = arith.constant 0 : index
    %32 = vector.load %arg13[%c0_28, %c0_29] : memref<1x64xf32, #tpu.memory_space<vmem>>, vector<1x64xf32>
    %33 = vector.broadcast %32 : vector<1x64xf32> to vector<8x64xf32>
    %34 = arith.addf %31, %33 : vector<8x64xf32>
    %35 = math.tanh %34 : vector<8x64xf32>
    %c0_30 = arith.constant 0 : index
    %c0_31 = arith.constant 0 : index
    %36 = vector.load %arg14[%c0_30, %c0_31] : memref<64x128xf32, #tpu.memory_space<vmem>>, vector<64x128xf32>
    %cst_32 = arith.constant dense<0.000000e+00> : vector<8x128xf32>
    %37 = tpu.matmul %35, %36, %cst_32 {dimension_numbers = #tpu.dot_dimension_numbers<[1], [0], [0], [1], [0, 0, 1, 1], [], []>} : vector<8x64xf32>, vector<64x128xf32>, vector<8x128xf32> -> vector<8x128xf32>
    %c0_33 = arith.constant 0 : index
    %c0_34 = arith.constant 0 : index
    %38 = vector.load %arg15[%c0_33, %c0_34] : memref<1x128xf32, #tpu.memory_space<vmem>>, vector<1x128xf32>
    %39 = vector.broadcast %38 : vector<1x128xf32> to vector<8x128xf32>
    %40 = arith.addf %37, %39 : vector<8x128xf32>
    %41 = math.tanh %40 : vector<8x128xf32>
    %c0_35 = arith.constant 0 : index
    %c0_36 = arith.constant 0 : index
    %42 = vector.load %arg16[%c0_35, %c0_36] : memref<128x896xf32, #tpu.memory_space<vmem>>, vector<128x896xf32>
    %cst_37 = arith.constant dense<0.000000e+00> : vector<8x896xf32>
    %43 = tpu.matmul %41, %42, %cst_37 {dimension_numbers = #tpu.dot_dimension_numbers<[1], [0], [0], [1], [0, 0, 1, 1], [], []>} : vector<8x128xf32>, vector<128x896xf32>, vector<8x896xf32> -> vector<8x896xf32>
    %c0_38 = arith.constant 0 : index
    %c0_39 = arith.constant 0 : index
    %44 = vector.load %arg17[%c0_38, %c0_39] : memref<1x896xf32, #tpu.memory_space<vmem>>, vector<1x896xf32>
    %45 = vector.broadcast %44 : vector<1x896xf32> to vector<8x896xf32>
    %46 = arith.addf %43, %45 : vector<8x896xf32>
    %47 = arith.negf %46 : vector<8x896xf32>
    %48 = math.exp %47 : vector<8x896xf32>
    %cst_40 = arith.constant 1.000000e+00 : f32
    %49 = vector.broadcast %cst_40 : f32 to vector<8x896xf32>
    %50 = arith.addf %49, %48 : vector<8x896xf32>
    %51 = arith.divf %49, %50 : vector<8x896xf32>
    %c0_41 = arith.constant 0 : index
    %c0_42 = arith.constant 0 : index
    %52 = vector.load %arg18[%c0_41, %c0_42] : memref<8x128xf32, #tpu.memory_space<vmem>>, vector<8x128xf32>
    tpu.vector_store %arg18[%c0_41, %c0_42], %23 {strides = array<i32>} : memref<8x128xf32, #tpu.memory_space<vmem>>, vector<8x128xf32>,
    %c0_43 = arith.constant 0 : index
    %c0_44 = arith.constant 0 : index
    %53 = vector.load %arg19[%c0_43, %c0_44] : memref<8x896xf32, #tpu.memory_space<vmem>>, vector<8x896xf32>
    tpu.vector_store %arg19[%c0_43, %c0_44], %51 {strides = array<i32>} : memref<8x896xf32, #tpu.memory_space<vmem>>, vector<8x896xf32>,
    return
  }
  func.func @transform_0(%arg0: i32) -> (i32, i32) {
    %c0_i32 = arith.constant 0 : i32
    %c0_i32_0 = arith.constant 0 : i32
    return %arg0, %c0_i32 : i32, i32
  }
  func.func @transform_1(%arg0: i32) -> (i32, i32) {
    %c0_i32 = arith.constant 0 : i32
    %c0_i32_0 = arith.constant 0 : i32
    %c0_i32_1 = arith.constant 0 : i32
    return %c0_i32, %c0_i32_0 : i32, i32
  }
  func.func @transform_2(%arg0: i32) -> (i32, i32) {
    %c0_i32 = arith.constant 0 : i32
    %c0_i32_0 = arith.constant 0 : i32
    %c0_i32_1 = arith.constant 0 : i32
    return %c0_i32, %c0_i32_0 : i32, i32
  }
  func.func @transform_3(%arg0: i32) -> (i32, i32) {
    %c0_i32 = arith.constant 0 : i32
    %c0_i32_0 = arith.constant 0 : i32
    %c0_i32_1 = arith.constant 0 : i32
    return %c0_i32, %c0_i32_0 : i32, i32
  }
  func.func @transform_4(%arg0: i32) -> (i32, i32) {
    %c0_i32 = arith.constant 0 : i32
    %c0_i32_0 = arith.constant 0 : i32
    %c0_i32_1 = arith.constant 0 : i32
    return %c0_i32, %c0_i32_0 : i32, i32
  }
  func.func @transform_5(%arg0: i32) -> (i32, i32) {
    %c0_i32 = arith.constant 0 : i32
    %c0_i32_0 = arith.constant 0 : i32
    %c0_i32_1 = arith.constant 0 : i32
    return %c0_i32, %c0_i32_0 : i32, i32
  }
  func.func @transform_6(%arg0: i32) -> (i32, i32) {
    %c0_i32 = arith.constant 0 : i32
    %c0_i32_0 = arith.constant 0 : i32
    %c0_i32_1 = arith.constant 0 : i32
    return %c0_i32, %c0_i32_0 : i32, i32
  }
  func.func @transform_7(%arg0: i32) -> (i32, i32) {
    %c0_i32 = arith.constant 0 : i32
    %c0_i32_0 = arith.constant 0 : i32
    %c0_i32_1 = arith.constant 0 : i32
    return %c0_i32, %c0_i32_0 : i32, i32
  }
  func.func @transform_8(%arg0: i32) -> (i32, i32) {
    %c0_i32 = arith.constant 0 : i32
    %c0_i32_0 = arith.constant 0 : i32
    %c0_i32_1 = arith.constant 0 : i32
    return %c0_i32, %c0_i32_0 : i32, i32
  }
  func.func @transform_9(%arg0: i32) -> (i32, i32) {
    %c0_i32 = arith.constant 0 : i32
    %c0_i32_0 = arith.constant 0 : i32
    %c0_i32_1 = arith.constant 0 : i32
    return %c0_i32, %c0_i32_0 : i32, i32
  }
  func.func @transform_10(%arg0: i32) -> (i32, i32) {
    %c0_i32 = arith.constant 0 : i32
    %c0_i32_0 = arith.constant 0 : i32
    %c0_i32_1 = arith.constant 0 : i32
    return %c0_i32, %c0_i32_0 : i32, i32
  }
  func.func @transform_11(%arg0: i32) -> (i32, i32) {
    %c0_i32 = arith.constant 0 : i32
    %c0_i32_0 = arith.constant 0 : i32
    %c0_i32_1 = arith.constant 0 : i32
    return %c0_i32, %c0_i32_0 : i32, i32
  }
  func.func @transform_12(%arg0: i32) -> (i32, i32) {
    %c0_i32 = arith.constant 0 : i32
    %c0_i32_0 = arith.constant 0 : i32
    %c0_i32_1 = arith.constant 0 : i32
    return %c0_i32, %c0_i32_0 : i32, i32
  }
  func.func @transform_13(%arg0: i32) -> (i32, i32) {
    %c0_i32 = arith.constant 0 : i32
    %c0_i32_0 = arith.constant 0 : i32
    %c0_i32_1 = arith.constant 0 : i32
    return %c0_i32, %c0_i32_0 : i32, i32
  }
  func.func @transform_14(%arg0: i32) -> (i32, i32) {
    %c0_i32 = arith.constant 0 : i32
    %c0_i32_0 = arith.constant 0 : i32
    %c0_i32_1 = arith.constant 0 : i32
    return %c0_i32, %c0_i32_0 : i32, i32
  }
  func.func @transform_15(%arg0: i32) -> (i32, i32) {
    %c0_i32 = arith.constant 0 : i32
    %c0_i32_0 = arith.constant 0 : i32
    %c0_i32_1 = arith.constant 0 : i32
    return %c0_i32, %c0_i32_0 : i32, i32
  }
  func.func @transform_16(%arg0: i32) -> (i32, i32) {
    %c0_i32 = arith.constant 0 : i32
    %c0_i32_0 = arith.constant 0 : i32
    %c0_i32_1 = arith.constant 0 : i32
    return %c0_i32, %c0_i32_0 : i32, i32
  }
  func.func @transform_17(%arg0: i32) -> (i32, i32) {
    %c0_i32 = arith.constant 0 : i32
    %c0_i32_0 = arith.constant 0 : i32
    return %arg0, %c0_i32 : i32, i32
  }
  func.func @transform_18(%arg0: i32) -> (i32, i32) {
    %c0_i32 = arith.constant 0 : i32
    %c0_i32_0 = arith.constant 0 : i32
    return %arg0, %c0_i32 : i32, i32
  }
}

</mosaic_0001>

<bundles_post_ra>
// kernel: autoencoder_forward.1
= control target key start
LH: loop header
LB: loop body
LE: loop exit
PB: predicated region body
PF: predicated region fallthrough
CT: control target
= control target key end

     0   :  { %s2108_s0 = inlined_call_operand.vmem [shape: f32[8,896], index: 0, kind: input, shape index: {}]   ;;  %s2109_s1 = inlined_call_operand.vmem [shape: f32[896,128], index: 1, kind: input, shape index: {}]   ;;  %s2110_s2 = inlined_call_operand.vmem [shape: f32[1,128], index: 2, kind: input, shape index: {}]   ;;  %s2111_s3 = inlined_call_operand.vmem [shape: f32[128,64], index: 3, kind: input, shape index: {}]   ;;  %s2112_s4 = inlined_call_operand.vmem [shape: f32[1,64], index: 4, kind: input, shape index: {}]   ;;  %s2113_s5 = inlined_call_operand.vmem [shape: f32[64,12], index: 5, kind: input, shape index: {}]   ;;  %s2114_s6 = inlined_call_operand.vmem [shape: f32[1,12], index: 6, kind: input, shape index: {}]   ;;  %s2115_s7 = inlined_call_operand.vmem [shape: f32[12,128], index: 7, kind: input, shape index: {}]   ;;  %s2116_s8 = inlined_call_operand.vmem [shape: f32[1,128], index: 8, kind: input, shape index: {}]   ;;  %s2117_s9 = inlined_call_operand.vmem [shape: f32[128,12], index: 9, kind: input, shape index: {}]   ;;  %s2118_s10 = inlined_call_operand.vmem [shape: f32[1,12], index: 10, kind: input, shape index: {}]   ;;  %s2119_s11 = inlined_call_operand.vmem [shape: f32[12,64], index: 11, kind: input, shape index: {}]   ;;  %s2120_s12 = inlined_call_operand.vmem [shape: f32[1,64], index: 12, kind: input, shape index: {}]   ;;  %s2121_s13 = inlined_call_operand.vmem [shape: f32[64,128], index: 13, kind: input, shape index: {}]   ;;  %s2122_s14 = inlined_call_operand.vmem [shape: f32[1,128], index: 14, kind: input, shape index: {}]   ;;  %s2123_s15 = inlined_call_operand.vmem [shape: f32[128,896], index: 15, kind: input, shape index: {}]   ;;  %s2124_s16 = inlined_call_operand.vmem [shape: f32[1,896], index: 16, kind: input, shape index: {}]   ;;  %s2125_s17 = inlined_call_operand.vmem [shape: f32[8,128], index: 17, kind: output, shape index: {0}]   ;;  %s2126_s18 = inlined_call_operand.hbm [shape: f32[8,896], index: 18, kind: output, shape index: {1}]  }
   0x1   :  { %2129 = sst [smem:[#allocation5_spill]] %s2108_s0 }
   0x2   :  { %2130 = sst [smem:[#allocation6_spill]] %s2109_s1 }
   0x3   :  { %2131 = sst [smem:[#allocation7_spill]] %s2110_s2 }
   0x4   :  { %s2132_s29 = sld [smem:[#allocation6_spill]] }
   0x5   :  { %s2133_s19 = sld [smem:[#allocation5_spill]] }
   0xa   :  { %v113_v0 = vld [vmem:[%s2132_s29 + $0x178] sm:$0xff]  ;;  %v112_v2 = vld [vmem:[%s2132_s29 + $0x170] sm:$0xff]  ;;  %v111_v5 = vld [vmem:[%s2132_s29 + $0x168] sm:$0xff] }
   0xb   :  { %v81_v1 = vld [vmem:[%s2132_s29 + $0x78] sm:$0xff]  ;;  %222 = vmatpush.msra.mxu2 %v113_v0  ;;  %v80_v3 = vld [vmem:[%s2132_s29 + $0x70] sm:$0xff]  ;;  %v79_v6 = vld [vmem:[%s2132_s29 + $0x68] sm:$0xff] }
   0xc   :  { %182 = vmatpush.msra.mxu0 %v81_v1  ;;  %v97_v4 = vld [vmem:[%s2132_s29 + $0xf8] sm:$0xff]  ;;  %v96_v7 = vld [vmem:[%s2132_s29 + $0xf0] sm:$0xff]  ;;  %v95_v8 = vld [vmem:[%s2132_s29 + $0xe8] sm:$0xff] }
   0xd   :  { %202 = vmatpush.msra.mxu1 %v97_v4  ;;  %223 = vmatpush.msra.mxu2 %v112_v2  ;;  %v110_v9 = vld [vmem:[%s2132_s29 + $0x160] sm:$0xff]  ;;  %v109_v12 = vld [vmem:[%s2132_s29 + $0x158] sm:$0xff]  ;;  %v108_v15 = vld [vmem:[%s2132_s29 + $0x150] sm:$0xff] }
   0xe   :  { %183 = vmatpush.msra.mxu0 %v80_v3  ;;  %v78_v10 = vld [vmem:[%s2132_s29 + $0x60] sm:$0xff]  ;;  %v77_v13 = vld [vmem:[%s2132_s29 + $0x58] sm:$0xff]  ;;  %v76_v16 = vld [vmem:[%s2132_s29 + $0x50] sm:$0xff] }
   0xf   :  { %203 = vmatpush.msra.mxu1 %v96_v7  ;;  %224 = vmatpush.msra.mxu2 %v111_v5  ;;  %v94_v11 = vld [vmem:[%s2132_s29 + $0xe0] sm:$0xff]  ;;  %v93_v14 = vld [vmem:[%s2132_s29 + $0xd8] sm:$0xff]  ;;  %v92_v17 = vld [vmem:[%s2132_s29 + $0xd0] sm:$0xff] }
  0x10   :  { %184 = vmatpush.msra.mxu0 %v79_v6  ;;  %v107_v18 = vld [vmem:[%s2132_s29 + $0x148] sm:$0xff]  ;;  %v106_v21 = vld [vmem:[%s2132_s29 + $0x140] sm:$0xff]  ;;  %v129_v23 = vld [vmem:[%s2132_s29 + $0x1f8] sm:$0xff] }
  0x11   :  { %204 = vmatpush.msra.mxu1 %v95_v8  ;;  %225 = vmatpush.msra.mxu2 %v110_v9  ;;  %v75_v19 = vld [vmem:[%s2132_s29 + $0x48] sm:$0xff]  ;;  %v74_v22 = vld [vmem:[%s2132_s29 + $0x40] sm:$0xff]  ;;  %v128_v25 = vld [vmem:[%s2132_s29 + $0x1f0] sm:$0xff] }
  0x12   :  { %185 = vmatpush.msra.mxu0 %v78_v10  ;;  %v91_v20 = vld [vmem:[%s2132_s29 + $0xc8] sm:$0xff]  ;;  %v90_v24 = vld [vmem:[%s2132_s29 + $0xc0] sm:$0xff]  ;;  %v105_v26 = vld [vmem:[%s2132_s29 + $0x138] sm:$0xff]  ;;  %242 = vmatpush.msra.mxu3 %v129_v23 }
  0x13   :  { %205 = vmatpush.msra.mxu1 %v94_v11  ;;  %226 = vmatpush.msra.mxu2 %v109_v12  ;;  %v73_v27 = vld [vmem:[%s2132_s29 + $0x38] sm:$0xff]  ;;  %v127_v29 = vld [vmem:[%s2132_s29 + $0x1e8] sm:$0xff]  ;;  %v104_v30 = vld [vmem:[%s2132_s29 + $0x130] sm:$0xff] }
  0x14   :  { %186 = vmatpush.msra.mxu0 %v77_v13  ;;  %v89_v28 = vld [vmem:[%s2132_s29 + $0xb8] sm:$0xff]  ;;  %v72_v31 = vld [vmem:[%s2132_s29 + $0x30] sm:$0xff]  ;;  %243 = vmatpush.msra.mxu3 %v128_v25  ;;  %v126_v33 = vld [vmem:[%s2132_s29 + $0x1e0] sm:$0xff] }
  0x15   :  { %206 = vmatpush.msra.mxu1 %v93_v14  ;;  %227 = vmatpush.msra.mxu2 %v108_v15  ;;  %v88_v32 = vld [vmem:[%s2132_s29 + $0xb0] sm:$0xff]  ;;  %v103_v34 = vld [vmem:[%s2132_s29 + $0x128] sm:$0xff]  ;;  %v125_v37 = vld [vmem:[%s2132_s29 + $0x1d8] sm:$0xff] }
  0x16   :  { %187 = vmatpush.msra.mxu0 %v76_v16  ;;  %v71_v35 = vld [vmem:[%s2132_s29 + $0x28] sm:$0xff]  ;;  %244 = vmatpush.msra.mxu3 %v127_v29  ;;  %v102_v38 = vld [vmem:[%s2132_s29 + $0x120] sm:$0xff]  ;;  %v124_v41 = vld [vmem:[%s2132_s29 + $0x1d0] sm:$0xff] }
  0x17   :  { %207 = vmatpush.msra.mxu1 %v92_v17  ;;  %228 = vmatpush.msra.mxu2 %v107_v18  ;;  %v87_v36 = vld [vmem:[%s2132_s29 + $0xa8] sm:$0xff]  ;;  %v70_v39 = vld [vmem:[%s2132_s29 + $0x20] sm:$0xff]  ;;  %v101_v42 = vld [vmem:[%s2132_s29 + $0x118] sm:$0xff] }
  0x18   :  { %188 = vmatpush.msra.mxu0 %v75_v19  ;;  %245 = vmatpush.msra.mxu3 %v126_v33  ;;  %v86_v40 = vld [vmem:[%s2132_s29 + $0xa0] sm:$0xff]  ;;  %v69_v43 = vld [vmem:[%s2132_s29 + $0x18] sm:$0xff]  ;;  %v123_v45 = vld [vmem:[%s2132_s29 + $0x1c8] sm:$0xff] }
  0x19   :  { %208 = vmatpush.msra.mxu1 %v91_v20  ;;  %229 = vmatpush.msra.mxu2 %v106_v21  ;;  %v85_v44 = vld [vmem:[%s2132_s29 + $0x98] sm:$0xff]  ;;  %v100_v46 = vld [vmem:[%s2132_s29 + $0x110] sm:$0xff]  ;;  %v122_v49 = vld [vmem:[%s2132_s29 + $0x1c0] sm:$0xff] }
  0x1a   :  { %189 = vmatpush.msra.mxu0 %v74_v22  ;;  %246 = vmatpush.msra.mxu3 %v125_v37  ;;  %v68_v47 = vld [vmem:[%s2132_s29 + $0x10] sm:$0xff]  ;;  %v99_v50 = vld [vmem:[%s2132_s29 + $0x108] sm:$0xff]  ;;  %v121_v53 = vld [vmem:[%s2132_s29 + $0x1b8] sm:$0xff] }
  0x1b   :  { %209 = vmatpush.msra.mxu1 %v90_v24  ;;  %230 = vmatpush.msra.mxu2 %v105_v26  ;;  %v84_v48 = vld [vmem:[%s2132_s29 + $0x90] sm:$0xff]  ;;  %v67_v51 = vld [vmem:[%s2132_s29 + $0x8] sm:$0xff]  ;;  %v98_v54 = vld [vmem:[%s2132_s29 + $0x100] sm:$0xff] }
  0x1c   :  { %190 = vmatpush.msra.mxu0 %v73_v27  ;;  %247 = vmatpush.msra.mxu3 %v124_v41  ;;  %v83_v52 = vld [vmem:[%s2132_s29 + $0x88] sm:$0xff]  ;;  %v66_v55 = vld [vmem:[%s2132_s29] sm:$0xff]  ;;  %v177_v56 = vld [vmem:[%s2132_s29 + $0x378] sm:$0xff] }
  0x1d   :  { %210 = vmatpush.msra.mxu1 %v89_v28  ;;  %231 = vmatpush.msra.mxu2 %v104_v30  ;;  %v145_v57 = vld [vmem:[%s2132_s29 + $0x278] sm:$0xff]  ;;  %v82_v58 = vld [vmem:[%s2132_s29 + $0x80] sm:$0xff]  ;;  %v120_v59 = vld [vmem:[%s2132_s29 + $0x1b0] sm:$0xff] }
  0x1e   :  { %191 = vmatpush.msra.mxu0 %v72_v31  ;;  %248 = vmatpush.msra.mxu3 %v123_v45  ;;  %v176_v60 = vld [vmem:[%s2132_s29 + $0x370] sm:$0xff]  ;;  %v161_v62 = vld [vmem:[%s2132_s29 + $0x2f8] sm:$0xff]  ;;  %v119_v63 = vld [vmem:[%s2132_s29 + $0x1a8] sm:$0xff] }
  0x1f   :  { %211 = vmatpush.msra.mxu1 %v88_v32  ;;  %232 = vmatpush.msra.mxu2 %v103_v34  ;;  %v144_v61 = vld [vmem:[%s2132_s29 + $0x270] sm:$0xff]  ;;  %v175_v0 = vld [vmem:[%s2132_s29 + $0x368] sm:$0xff]  ;;  %v118_v3 = vld [vmem:[%s2132_s29 + $0x1a0] sm:$0xff] }
  0x20   :  { %192 = vmatpush.msra.mxu0 %v71_v35  ;;  %249 = vmatpush.msra.mxu3 %v122_v49  ;;  %v143_v1 = vld [vmem:[%s2132_s29 + $0x268] sm:$0xff]  ;;  %v160_v2 = vld [vmem:[%s2132_s29 + $0x2f0] sm:$0xff]  ;;  %v174_v4 = vld [vmem:[%s2132_s29 + $0x360] sm:$0xff] }
  0x21   :  { %212 = vmatpush.msra.mxu1 %v87_v36  ;;  %233 = vmatpush.msra.mxu2 %v102_v38  ;;  %v142_v5 = vld [vmem:[%s2132_s29 + $0x260] sm:$0xff]  ;;  %v159_v6 = vld [vmem:[%s2132_s29 + $0x2e8] sm:$0xff]  ;;  %v117_v7 = vld [vmem:[%s2132_s29 + $0x198] sm:$0xff] }
  0x22   :  { %193 = vmatpush.msra.mxu0 %v70_v39  ;;  %250 = vmatpush.msra.mxu3 %v121_v53  ;;  %v173_v8 = vld [vmem:[%s2132_s29 + $0x358] sm:$0xff]  ;;  %v158_v10 = vld [vmem:[%s2132_s29 + $0x2e0] sm:$0xff]  ;;  %v172_v11 = vld [vmem:[%s2132_s29 + $0x350] sm:$0xff] }
  0x23   :  { %213 = vmatpush.msra.mxu1 %v86_v40  ;;  %234 = vmatpush.msra.mxu2 %v101_v42  ;;  %v141_v9 = vld [vmem:[%s2132_s29 + $0x258] sm:$0xff]  ;;  %v116_v12 = vld [vmem:[%s2132_s29 + $0x190] sm:$0xff]  ;;  %v171_v15 = vld [vmem:[%s2132_s29 + $0x348] sm:$0xff] }
  0x24   :  { %194 = vmatpush.msra.mxu0 %v69_v43  ;;  %251 = vmatpush.msra.mxu3 %v120_v59  ;;  %v140_v13 = vld [vmem:[%s2132_s29 + $0x250] sm:$0xff]  ;;  %v157_v14 = vld [vmem:[%s2132_s29 + $0x2d8] sm:$0xff]  ;;  %v139_v16 = vld [vmem:[%s2132_s29 + $0x248] sm:$0xff] }
  0x25   :  { %214 = vmatpush.msra.mxu1 %v85_v44  ;;  %235 = vmatpush.msra.mxu2 %v100_v46  ;;  %v156_v17 = vld [vmem:[%s2132_s29 + $0x2d0] sm:$0xff]  ;;  %v115_v18 = vld [vmem:[%s2132_s29 + $0x188] sm:$0xff]  ;;  %v170_v19 = vld [vmem:[%s2132_s29 + $0x340] sm:$0xff] }
  0x26   :  { %195 = vmatpush.msra.mxu0 %v68_v47  ;;  %252 = vmatpush.msra.mxu3 %v119_v63  ;;  %v138_v20 = vld [vmem:[%s2132_s29 + $0x240] sm:$0xff]  ;;  %v61_v21 = vld [vmem:[%s2133_s19 + $0x10] sm:$0xff]  ;;  %v155_v22 = vld [vmem:[%s2132_s29 + $0x2c8] sm:$0xff] }
  0x27   :  { %215 = vmatpush.msra.mxu1 %v84_v48  ;;  %236 = vmatpush.msra.mxu2 %v99_v50  ;;  %v114_v23 = vld [vmem:[%s2132_s29 + $0x180] sm:$0xff] }
  0x28   :  { %196 = vmatpush.msra.mxu0 %v67_v51  ;;  %253 = vmatpush.msra.mxu3 %v118_v3 }
  0x29   :  { %216 = vmatpush.msra.mxu1 %v83_v52  ;;  %237 = vmatpush.msra.mxu2 %v98_v54 }
  0x2a   :  { %197 = vmatpush.msra.mxu0 %v66_v55  ;;  %254 = vmatpush.msra.mxu3 %v117_v7 }
  0x2b   :  { %302 = vmatpush.msrb.mxu2 %v177_v56  ;;  %217 = vmatpush.msra.mxu1 %v82_v58 }
  0x2c   :  { %262 = vmatpush.msrb.mxu0 %v145_v57  ;;  %255 = vmatpush.msra.mxu3 %v116_v12 }
  0x2d   :  { %303 = vmatpush.msrb.mxu2 %v176_v60  ;;  %282 = vmatpush.msrb.mxu1 %v161_v62 }
  0x2e   :  { %263 = vmatpush.msrb.mxu0 %v144_v61  ;;  %256 = vmatpush.msra.mxu3 %v115_v18 }
  0x2f   :  { %304 = vmatpush.msrb.mxu2 %v175_v0  ;;  %283 = vmatpush.msrb.mxu1 %v160_v2 }
  0x30   :  { %264 = vmatpush.msrb.mxu0 %v143_v1 }
  0x31   :  { %305 = vmatpush.msrb.mxu2 %v174_v4  ;;  %284 = vmatpush.msrb.mxu1 %v159_v6 }
  0x32   :  { %265 = vmatpush.msrb.mxu0 %v142_v5 }
  0x33   :  { %306 = vmatpush.msrb.mxu2 %v173_v8  ;;  %285 = vmatpush.msrb.mxu1 %v158_v10 }
  0x34   :  { %266 = vmatpush.msrb.mxu0 %v141_v9 }
  0x35   :  { %307 = vmatpush.msrb.mxu2 %v172_v11  ;;  %286 = vmatpush.msrb.mxu1 %v157_v14 }
  0x36   :  { %267 = vmatpush.msrb.mxu0 %v140_v13 }
  0x37   :  { %308 = vmatpush.msrb.mxu2 %v171_v15 }
  0x38   :  { %268 = vmatpush.msrb.mxu0 %v139_v16 }
  0x39   :  { %24 = vsyncpa [#allocation3], 0  ;;  %287 = vmatpush.msrb.mxu1 %v156_v17  ;;  %v169_v24 = vld [vmem:[%s2132_s29 + $0x338] sm:$0xff]  ;;  %238 = vmatmul.f32.vlgmr.msra.gmra.mxu2 %v61_v21  ;;  %v154_v26 = vld [vmem:[%s2132_s29 + $0x2c0] sm:$0xff]  ;;  %s2134_s30 = sld [smem:[#allocation7_spill]]  ;;  %vm376_vm0 = vcmask 523264  }
  0x3a   :  { %v137_v25 = vld [vmem:[%s2132_s29 + $0x238] sm:$0xff]  ;;  %309 = vmatpush.msrb.mxu2 %v170_v19  ;;  %269 = vmatpush.msrb.mxu0 %v138_v20  ;;  %v59_v27 = vld [vmem:[%s2133_s19] sm:$0xff]  ;;  %v168_v28 = vld [vmem:[%s2132_s29 + $0x330] sm:$0xff]  ;;  %vm411_vm1 = vcmask 1043456   ;;  %vm407_vm2 = vcmask 97280  }
  0x3b   :  { %288 = vmatpush.msrb.mxu1 %v155_v22  ;;  %v136_v29 = vld [vmem:[%s2132_s29 + $0x230] sm:$0xff]  ;;  %257 = vmatpush.msra.mxu3 %v114_v23  ;;  %v153_v30 = vld [vmem:[%s2132_s29 + $0x2b8] sm:$0xff]  ;;  %v167_v32 = vld [vmem:[%s2132_s29 + $0x328] sm:$0xff] }
  0x3c   :  { %310 = vmatpush.msrb.mxu2 %v169_v24  ;;  %270 = vmatpush.msrb.mxu0 %v137_v25  ;;  %v62_v31 = vld [vmem:[%s2133_s19 + $0x18] sm:$0xff]  ;;  %v135_v33 = vld [vmem:[%s2132_s29 + $0x228] sm:$0xff]  ;;  %v152_v34 = vld [vmem:[%s2132_s29 + $0x2b0] sm:$0xff] }
  0x3d   :  { %289 = vmatpush.msrb.mxu1 %v154_v26  ;;  %198 = vmatmul.f32.vlgmr.msra.gmra.mxu0 %v59_v27  ;;  %v338_v35 = vld [vmem:[%s2111_s3 + $0x78] sm:$0xff]  ;;  %v166_v36 = vld [vmem:[%s2132_s29 + $0x320] sm:$0xff]  ;;  %v151_v38 = vld [vmem:[%s2132_s29 + $0x2a8] sm:$0xff] }
  0x3e   :  { %311 = vmatpush.msrb.mxu2 %v168_v28  ;;  %271 = vmatpush.msrb.mxu0 %v136_v29  ;;  %v134_v37 = vld [vmem:[%s2132_s29 + $0x220] sm:$0xff]  ;;  %v337_v39 = vld [vmem:[%s2111_s3 + $0x70] sm:$0xff]  ;;  %v165_v40 = vld [vmem:[%s2132_s29 + $0x318] sm:$0xff] }
  0x3f   :  { %290 = vmatpush.msrb.mxu1 %v153_v30  ;;  %258 = vmatmul.f32.vlgmr.msra.gmra.mxu3 %v62_v31  ;;  %v133_v41 = vld [vmem:[%s2132_s29 + $0x218] sm:$0xff]  ;;  %v150_v42 = vld [vmem:[%s2132_s29 + $0x2a0] sm:$0xff]  ;;  %v336_v43 = vld [vmem:[%s2111_s3 + $0x68] sm:$0xff] }
  0x40   :  { %312 = vmatpush.msrb.mxu2 %v167_v32  ;;  %272 = vmatpush.msrb.mxu0 %v135_v33  ;;  %v164_v44 = vld [vmem:[%s2132_s29 + $0x310] sm:$0xff]  ;;  %v60_v45 = vld [vmem:[%s2133_s19 + $0x8] sm:$0xff]  ;;  %v149_v47 = vld [vmem:[%s2132_s29 + $0x298] sm:$0xff] }
  0x41   :  { %291 = vmatpush.msrb.mxu1 %v152_v34  ;;  %343 = vmatpush.msrb.mxu3 %v338_v35  ;;  %v132_v46 = vld [vmem:[%s2132_s29 + $0x210] sm:$0xff]  ;;  %v163_v48 = vld [vmem:[%s2132_s29 + $0x308] sm:$0xff]  ;;  %v335_v49 = vld [vmem:[%s2111_s3 + $0x60] sm:$0xff] }
  0x42   :  { %313 = vmatpush.msrb.mxu2 %v166_v36  ;;  %273 = vmatpush.msrb.mxu0 %v134_v37  ;;  %v131_v50 = vld [vmem:[%s2132_s29 + $0x208] sm:$0xff]  ;;  %v148_v51 = vld [vmem:[%s2132_s29 + $0x290] sm:$0xff]  ;;  %v162_v52 = vld [vmem:[%s2132_s29 + $0x300] sm:$0xff] }
  0x43   :  { %292 = vmatpush.msrb.mxu1 %v151_v38  ;;  %344 = vmatpush.msrb.mxu3 %v337_v39  ;;  %v334_v53 = vld [vmem:[%s2111_s3 + $0x58] sm:$0xff]  ;;  %v65_v54 = vld [vmem:[%s2133_s19 + $0x30] sm:$0xff]  ;;  %v130_v55 = vld [vmem:[%s2132_s29 + $0x200] sm:$0xff] }
  0x44   :  { %314 = vmatpush.msrb.mxu2 %v165_v40  ;;  %274 = vmatpush.msrb.mxu0 %v133_v41  ;;  %v147_v56 = vld [vmem:[%s2132_s29 + $0x288] sm:$0xff]  ;;  %v63_v57 = vld [vmem:[%s2133_s19 + $0x20] sm:$0xff]  ;;  %v333_v60 = vld [vmem:[%s2111_s3 + $0x50] sm:$0xff] }
  0x45   :  { %293 = vmatpush.msrb.mxu1 %v150_v42  ;;  %345 = vmatpush.msrb.mxu3 %v336_v43  ;;  %v146_v58 = vld [vmem:[%s2132_s29 + $0x280] sm:$0xff]  ;;  %v64_v59 = vld [vmem:[%s2133_s19 + $0x28] sm:$0xff]  ;;  %v330_v63 = vld [vmem:[%s2111_s3 + $0x38] sm:$0xff] }
  0x46   :  { %315 = vmatpush.msrb.mxu2 %v164_v44  ;;  %218 = vmatmul.f32.vlgmr.msra.gmra.mxu1 %v60_v45  ;;  %v332_v61 = vld [vmem:[%s2111_s3 + $0x48] sm:$0xff]  ;;  %v331_v62 = vld [vmem:[%s2111_s3 + $0x40] sm:$0xff]  ;;  %v329_v0 = vld [vmem:[%s2111_s3 + $0x30] sm:$0xff] }
  0x47   :  { %275 = vmatpush.msrb.mxu0 %v132_v46  ;;  %294 = vmatpush.msrb.mxu1 %v149_v47  ;;  %v328_v1 = vld [vmem:[%s2111_s3 + $0x28] sm:$0xff]  ;;  %v327_v2 = vld [vmem:[%s2111_s3 + $0x20] sm:$0xff]  ;;  %v326_v3 = vld [vmem:[%s2111_s3 + $0x18] sm:$0xff] }
  0x48   :  { %316 = vmatpush.msrb.mxu2 %v163_v48  ;;  %346 = vmatpush.msrb.mxu3 %v335_v49  ;;  %v325_v4 = vld [vmem:[%s2111_s3 + $0x10] sm:$0xff]  ;;  %v324_v5 = vld [vmem:[%s2111_s3 + $0x8] sm:$0xff]  ;;  %v323_v6 = vld [vmem:[%s2111_s3] sm:$0xff] }
  0x49   :  { %276 = vmatpush.msrb.mxu0 %v131_v50  ;;  %295 = vmatpush.msrb.mxu1 %v148_v51  ;;  %v371_v7 = vld [vmem:[%s2113_s5 + $0x38] sm:$0xff]  ;;  %v370_v8 = vld [vmem:[%s2113_s5 + $0x30] sm:$0xff]  ;;  %v369_v9 = vld [vmem:[%s2113_s5 + $0x28] sm:$0xff] }
  0x4a   :  { %317 = vmatpush.msrb.mxu2 %v162_v52  ;;  %347 = vmatpush.msrb.mxu3 %v334_v53  ;;  %v988_v10 = vld [vmem:[%s2134_s30] ss:$0 sm:$0xff]  ;;  %v367_v27 = vld [vmem:[%s2113_s5 + $0x18] sm:$0xff]  ;;  %v366_v28 = vld [vmem:[%s2113_s5 + $0x10] sm:$0xff] }
  0x4b   :  { %318 = vmatmul.f32.vlgmr.msrb.gmra.mxu2 %v65_v54  ;;  %277 = vmatpush.msrb.mxu0 %v130_v55  ;;  %v368_v26 = vld [vmem:[%s2113_s5 + $0x20] sm:$0xff]  ;;  %v365_v29 = vld [vmem:[%s2113_s5 + $0x8] sm:$0xff]  ;;  %v450_v37 = vld [vmem:[%s2117_s9 + $0x78] sm:$0xff] }
  0x4c   :  { %296 = vmatpush.msrb.mxu1 %v147_v56  ;;  %278 = vmatmul.f32.vlgmr.msrb.gmra.mxu0 %v63_v57  ;;  %v364_v30 = vld [vmem:[%s2113_s5] sm:$0xff]  ;;  %v402_v35 = vld [vmem:[%s2115_s7 + $0x8] sm:$0xf]  ;;  %v449_v38 = vld [vmem:[%s2117_s9 + $0x70] sm:$0xff] }
  0x4d   :  { %348 = vmatpush.msrb.mxu3 %v333_v60  ;;  %388 = vmatpush.msra.mxu0 %v371_v7  ;;  %v989_v31 = vld [vmem:[%s2112_s4] ss:$0 sm:$0xff]  ;;  %v448_v39 = vld [vmem:[%s2117_s9 + $0x68] sm:$0xff]  ;;  %v446_v41 = vld [vmem:[%s2117_s9 + $0x58] sm:$0xff] }
  0x4e   :  { %297 = vmatpush.msrb.mxu1 %v146_v58  ;;  %v401_v36 = vld [vmem:[%s2115_s7] sm:$0xff]  ;;  %975 = vmatpush.msk.msra.mxu2 %vm411_vm1, %v402_v35  ;;  %v445_v42 = vld [vmem:[%s2117_s9 + $0x50] sm:$0xff]  ;;  %v444_v43 = vld [vmem:[%s2117_s9 + $0x48] sm:$0xff]  ;;  %s963_s7 = sshll.u32 %s2126_s18, 4  ;;  %s964_s7 = int_to_ptr.hbm [resolvable:$true] %s963_s7 }
  0x4f   :  { %298 = vmatmul.f32.vlgmr.msrb.gmra.mxu1 %v64_v59  ;;  %349 = vmatpush.msrb.mxu3 %v332_v61  ;;  %v447_v40 = vld [vmem:[%s2117_s9 + $0x60] sm:$0xff]  ;;  %v442_v45 = vld [vmem:[%s2117_s9 + $0x38] sm:$0xff]  ;;  %v441_v46 = vld [vmem:[%s2117_s9 + $0x30] sm:$0xff] }
  0x50   :  { %389 = vmatpush.msra.mxu0 %v370_v8  ;;  %430 = vmatpush.msra.mxu2 %v401_v36  ;;  %v443_v44 = vld [vmem:[%s2117_s9 + $0x40] sm:$0xff]  ;;  %v440_v47 = vld [vmem:[%s2117_s9 + $0x28] sm:$0xff]  ;;  %v438_v51 = vld [vmem:[%s2117_s9 + $0x18] sm:$0xff] }
  0x51   :  { %350 = vmatpush.msrb.mxu3 %v331_v62  ;;  %v990_v48 = vld [vmem:[%s2114_s6] ss:$0 sm:$0xff]  ;;  %v437_v53 = vld [vmem:[%s2117_s9 + $0x10] sm:$0xff]  ;;  %v436_v55 = vld [vmem:[%s2117_s9 + $0x8] sm:$0xff] }
  0x52   :  { %390 = vmatpush.msra.mxu0 %v369_v9  ;;  %455 = vmatpush.msrb.mxu2 %v450_v37  ;;  %v439_v49 = vld [vmem:[%s2117_s9 + $0x20] sm:$0xff]  ;;  %v477_v60 = vld [vmem:[%s2119_s11 + $0x8] sm:$0xf]  ;;  %v516_v62 = vld [vmem:[%s2121_s13 + $0x38] sm:$0xff] }
  0x53   :  { %351 = vmatpush.msrb.mxu3 %v330_v63  ;;  %v435_v56 = vld [vmem:[%s2117_s9] sm:$0xff]  ;;  %v515_v63 = vld [vmem:[%s2121_s13 + $0x30] sm:$0xff]  ;;  %532 = vmatpush.msra.mxu1 %v516_v62  ;;  %v510_v8 = vld [vmem:[%s2121_s13 + $0x8] sm:$0xff] }
  0x54   :  { %391 = vmatpush.msra.mxu0 %v368_v26  ;;  %456 = vmatpush.msrb.mxu2 %v449_v38  ;;  %v991_v57 = vld [vmem:[%s2116_s8] ss:$0 sm:$0xff]  ;;  %v511_v7 = vld [vmem:[%s2121_s13 + $0x10] sm:$0xff]  ;;  %v616_v26 = vld [vmem:[%s2123_s15 + $0x238] sm:$0xff] }
  0x55   :  { %352 = vmatpush.msrb.mxu3 %v329_v0  ;;  %v476_v61 = vld [vmem:[%s2119_s11] sm:$0xff]  ;;  %v514_v0 = vld [vmem:[%s2121_s13 + $0x28] sm:$0xff]  ;;  %533 = vmatpush.msra.mxu1 %v515_v63  ;;  %v595_v37 = vld [vmem:[%s2123_s15 + $0x190] sm:$0xff] }
  0x56   :  { %392 = vmatpush.msra.mxu0 %v367_v27  ;;  %457 = vmatpush.msrb.mxu2 %v448_v39  ;;  %v509_v9 = vld [vmem:[%s2121_s13] sm:$0xff]  ;;  %v646_v35 = vld [vmem:[%s2123_s15 + $0x328] sm:$0xff]  ;;  %v596_v38 = vld [vmem:[%s2123_s15 + $0x198] sm:$0xff] }
  0x57   :  { %353 = vmatpush.msrb.mxu3 %v328_v1  ;;  %534 = vmatpush.msra.mxu1 %v514_v0  ;;  %v992_v1 = vld [vmem:[%s2118_s10] ss:$0 sm:$0xff]  ;;  %v594_v36 = vld [vmem:[%s2123_s15 + $0x188] sm:$0xff]  ;;  %v639_v39 = vld [vmem:[%s2123_s15 + $0x2f0] sm:$0xff] }
  0x58   :  { %393 = vmatpush.msra.mxu0 %v366_v28  ;;  %458 = vmatpush.msrb.mxu2 %v447_v40  ;;  %v617_v27 = vld [vmem:[%s2123_s15 + $0x240] sm:$0xff]  ;;  %v608_v28 = vld [vmem:[%s2123_s15 + $0x1f8] sm:$0xff]  ;;  %v587_v40 = vld [vmem:[%s2123_s15 + $0x150] sm:$0xff] }
  0x59   :  { %354 = vmatpush.msrb.mxu3 %v327_v2  ;;  %v604_v62 = vld [vmem:[%s2123_s15 + $0x1d8] sm:$0xff]  ;;  %v553_v0 = vld [vmem:[%s2123_s15 + $0x40] sm:$0xff] }
  0x5a   :  { %394 = vmatpush.msra.mxu0 %v365_v29  ;;  %459 = vmatpush.msrb.mxu2 %v446_v41  ;;  %v609_v29 = vld [vmem:[%s2123_s15 + $0x200] sm:$0xff]  ;;  %v588_v41 = vld [vmem:[%s2123_s15 + $0x158] sm:$0xff] }
  0x5b   :  { %355 = vmatpush.msrb.mxu3 %v326_v3  ;;  %v552_v63 = vld [vmem:[%s2123_s15 + $0x38] sm:$0xff] }
  0x5c   :  { %395 = vmatpush.msra.mxu0 %v364_v30  ;;  %460 = vmatpush.msrb.mxu2 %v445_v42  ;;  %v610_v30 = vld [vmem:[%s2123_s15 + $0x208] sm:$0xff]  ;;  %v589_v42 = vld [vmem:[%s2123_s15 + $0x160] sm:$0xff] }
  0x5d   :  { %356 = vmatpush.msrb.mxu3 %v325_v4 }
  0x5e   :  { %461 = vmatpush.msrb.mxu2 %v444_v43  ;;  %v632_v43 = vld [vmem:[%s2123_s15 + $0x2b8] sm:$0xff] }
  0x5f   :  { %357 = vmatpush.msrb.mxu3 %v324_v5  ;;  %v513_v5 = vld [vmem:[%s2121_s13 + $0x20] sm:$0xff] }
  0x60   :  { %462 = vmatpush.msrb.mxu2 %v443_v44  ;;  %535 = vmatpush.msra.mxu1 %v513_v5  ;;  %v580_v44 = vld [vmem:[%s2123_s15 + $0x118] sm:$0xff]  ;;  %v654_v5 = vld [vmem:[%s2123_s15 + $0x368] sm:$0xff] }
  0x61   :  { %358 = vmatpush.msrb.mxu3 %v323_v6  ;;  %v512_v6 = vld [vmem:[%s2121_s13 + $0x18] sm:$0xff] }
  0x62   :  { %463 = vmatpush.msrb.mxu2 %v442_v45  ;;  %536 = vmatpush.msra.mxu1 %v512_v6  ;;  %v581_v45 = vld [vmem:[%s2123_s15 + $0x120] sm:$0xff]  ;;  %v547_v6 = vld [vmem:[%s2123_s15 + $0x10] sm:$0xff] }
  0x63   :  { %977 = vmatpush.msk.msra.mxu3 %vm411_vm1, %v477_v60  ;;  %v560_v60 = vld [vmem:[%s2123_s15 + $0x78] sm:$0xff] }
  0x64   :  { %464 = vmatpush.msrb.mxu2 %v441_v46  ;;  %537 = vmatpush.msra.mxu1 %v511_v7  ;;  %v993_v46 = vld [vmem:[%s2120_s12] ss:$0 sm:$0xff]  ;;  %v655_v7 = vld [vmem:[%s2123_s15 + $0x370] sm:$0xff] }
  0x65   :  { %503 = vmatpush.msra.mxu3 %v476_v61  ;;  %v561_v61 = vld [vmem:[%s2123_s15 + $0x80] sm:$0xff] }
  0x66   :  { %465 = vmatpush.msrb.mxu2 %v440_v47  ;;  %538 = vmatpush.msra.mxu1 %v510_v8  ;;  %v582_v47 = vld [vmem:[%s2123_s15 + $0x128] sm:$0xff] }
  0x68   :  { %466 = vmatpush.msrb.mxu2 %v439_v49  ;;  %539 = vmatpush.msra.mxu1 %v509_v9  ;;  %v573_v49 = vld [vmem:[%s2123_s15 + $0xe0] sm:$0xff]  ;;  %v656_v9 = vld [vmem:[%s2123_s15 + $0x378] sm:$0xff] }
  0x6a   :  { %467 = vmatpush.msrb.mxu2 %v438_v51  ;;  %v575_v51 = vld [vmem:[%s2123_s15 + $0xf0] sm:$0xff] }
  0x6c   :  { %468 = vmatpush.msrb.mxu2 %v437_v53 }
  0x6e   :  { %469 = vmatpush.msrb.mxu2 %v436_v55  ;;  %v567_v55 = vld [vmem:[%s2123_s15 + $0xb0] sm:$0xff] }
  0x70   :  { %470 = vmatpush.msrb.mxu2 %v435_v56 }
  0xba   :  { %v199_v11 = vpop.f32.mrf.mxu0 }
  0xbb   :  { %v200_v12 = vadd.f32 %v988_v10, %v199_v11  ;;  %v650_v10 = vld [vmem:[%s2123_s15 + $0x348] sm:$0xff]  ;;  %v651_v11 = vld [vmem:[%s2123_s15 + $0x350] sm:$0xff] }
  0xbc   :  { %v239_v14 = vpop.f32.mrf.mxu2  ;;  %693 = vmatpush.msrb.mxu0 %v651_v11  ;;  %v648_v11 = vld [vmem:[%s2123_s15 + $0x338] sm:$0xff] }
  0xc2   :  { %v259_v16 = vpop.f32.mrf.mxu3 }
  0xc3   :  { %v219_v13 = vpop.f32.mrf.mxu1 }
  0xc4   :  { %v220_v15 = vadd.f32 %v219_v13, %v200_v12  ;;  %v652_v12 = vld [vmem:[%s2123_s15 + $0x358] sm:$0xff]  ;;  %v643_v13 = vld [vmem:[%s2123_s15 + $0x310] sm:$0xff] }
  0xc5   :  { %713 = vmatpush.msrb.mxu1 %v652_v12  ;;  %v590_v12 = vld [vmem:[%s2123_s15 + $0x168] sm:$0xff] }
  0xc6   :  { %v240_v17 = vadd.f32 %v239_v14, %v220_v15  ;;  %v644_v14 = vld [vmem:[%s2123_s15 + $0x318] sm:$0xff]  ;;  %v645_v15 = vld [vmem:[%s2123_s15 + $0x320] sm:$0xff] }
  0xc7   :  { %694 = vmatpush.msrb.mxu0 %v644_v14  ;;  %714 = vmatpush.msrb.mxu1 %v645_v15  ;;  %v640_v14 = vld [vmem:[%s2123_s15 + $0x2f8] sm:$0xff]  ;;  %v641_v15 = vld [vmem:[%s2123_s15 + $0x300] sm:$0xff] }
  0xc8   :  { %v260_v18 = vadd.f32 %v259_v16, %v240_v17  ;;  %v636_v16 = vld [vmem:[%s2123_s15 + $0x2d8] sm:$0xff]  ;;  %v637_v17 = vld [vmem:[%s2123_s15 + $0x2e0] sm:$0xff] }
  0xc9   :  { %v279_v19 = vpop.f32.mrf.mxu0  ;;  %695 = vmatpush.msrb.mxu0 %v637_v17  ;;  %v642_v17 = vld [vmem:[%s2123_s15 + $0x308] sm:$0xff] }
  0xca   :  { %v280_v20 = vadd.f32 %v279_v19, %v260_v18  ;;  %v638_v18 = vld [vmem:[%s2123_s15 + $0x2e8] sm:$0xff]  ;;  %v629_v19 = vld [vmem:[%s2123_s15 + $0x2a0] sm:$0xff] }
  0xcb   :  { %715 = vmatpush.msrb.mxu1 %v638_v18  ;;  %v633_v18 = vld [vmem:[%s2123_s15 + $0x2c0] sm:$0xff] }
  0xcc   :  { %v299_v21 = vpop.f32.mrf.mxu1 }
  0xcd   :  { %v300_v22 = vadd.f32 %v299_v21, %v280_v20  ;;  %v630_v20 = vld [vmem:[%s2123_s15 + $0x2a8] sm:$0xff]  ;;  %v631_v21 = vld [vmem:[%s2123_s15 + $0x2b0] sm:$0xff] }
  0xce   :  { %v319_v23 = vpop.f32.mrf.mxu2  ;;  %696 = vmatpush.msrb.mxu0 %v630_v20  ;;  %716 = vmatpush.msrb.mxu1 %v631_v21  ;;  %v635_v20 = vld [vmem:[%s2123_s15 + $0x2d0] sm:$0xff]  ;;  %v626_v21 = vld [vmem:[%s2123_s15 + $0x288] sm:$0xff] }
  0xcf   :  { %v320_v24 = vadd.f32 %v319_v23, %v300_v22  ;;  %v622_v22 = vld [vmem:[%s2123_s15 + $0x268] sm:$0xff]  ;;  %v623_v23 = vld [vmem:[%s2123_s15 + $0x270] sm:$0xff] }
  0xd0   :  { %697 = vmatpush.msrb.mxu0 %v623_v23  ;;  %v628_v23 = vld [vmem:[%s2123_s15 + $0x298] sm:$0xff] }
  0xd1   :  { %995 = vtanh.f32 %v320_v24  ;;  %v624_v24 = vld [vmem:[%s2123_s15 + $0x278] sm:$0xff] }
  0xd2   :  { %717 = vmatpush.msrb.mxu1 %v624_v24  ;;  %698 = vmatpush.msrb.mxu0 %v616_v26  ;;  %v619_v24 = vld [vmem:[%s2123_s15 + $0x250] sm:$0xff]  ;;  %v621_v26 = vld [vmem:[%s2123_s15 + $0x260] sm:$0xff] }
  0xd4   :  { %718 = vmatpush.msrb.mxu1 %v617_v27  ;;  %699 = vmatpush.msrb.mxu0 %v609_v29  ;;  %v612_v27 = vld [vmem:[%s2123_s15 + $0x218] sm:$0xff]  ;;  %v614_v29 = vld [vmem:[%s2123_s15 + $0x228] sm:$0xff] }
  0xd6   :  { %719 = vmatpush.msrb.mxu1 %v610_v30  ;;  %v576_v30 = vld [vmem:[%s2123_s15 + $0xf8] sm:$0xff] }
  0xd7   :  { %v996_v25 = vpop.eup %995 }
  0xd8   :  { %359 = vmatmul.f32.vlgmr.msrb.gmra.mxu3 %v996_v25  ;;  %v615_v25 = vld [vmem:[%s2123_s15 + $0x230] sm:$0xff] }
  0xd9   :  { %673 = vmatpush.msrb.mxu3 %v650_v10  ;;  %v647_v10 = vld [vmem:[%s2123_s15 + $0x330] sm:$0xff] }
  0xdb   :  { %674 = vmatpush.msrb.mxu3 %v643_v13  ;;  %v649_v13 = vld [vmem:[%s2123_s15 + $0x340] sm:$0xff] }
  0xdd   :  { %675 = vmatpush.msrb.mxu3 %v636_v16  ;;  %v583_v16 = vld [vmem:[%s2123_s15 + $0x130] sm:$0xff] }
  0xdf   :  { %676 = vmatpush.msrb.mxu3 %v629_v19  ;;  %v634_v19 = vld [vmem:[%s2123_s15 + $0x2c8] sm:$0xff] }
  0xe1   :  { %677 = vmatpush.msrb.mxu3 %v622_v22  ;;  %v627_v22 = vld [vmem:[%s2123_s15 + $0x290] sm:$0xff] }
  0xe3   :  { %678 = vmatpush.msrb.mxu3 %v615_v25  ;;  %v620_v25 = vld [vmem:[%s2123_s15 + $0x258] sm:$0xff] }
  0xe5   :  { %679 = vmatpush.msrb.mxu3 %v608_v28  ;;  %v613_v28 = vld [vmem:[%s2123_s15 + $0x220] sm:$0xff] }
 0x15b   :  { %v360_v32 = vpop.f32.mrf.mxu3 }
 0x15c   :  { %v361_v33 = vadd.f32 %v989_v31, %v360_v32  ;;  %v601_v31 = vld [vmem:[%s2123_s15 + $0x1c0] sm:$0xff]  ;;  %v602_v32 = vld [vmem:[%s2123_s15 + $0x1c8] sm:$0xff] }
 0x15d   :  { %680 = vmatpush.msrb.mxu3 %v601_v31  ;;  %700 = vmatpush.msrb.mxu0 %v602_v32  ;;  %v605_v31 = vld [vmem:[%s2123_s15 + $0x1e0] sm:$0xff]  ;;  %v606_v32 = vld [vmem:[%s2123_s15 + $0x1e8] sm:$0xff] }
 0x15e   :  { %997 = vtanh.f32 %v361_v33  ;;  %v653_v33 = vld [vmem:[%s2123_s15 + $0x360] sm:$0xff] }
 0x15f   :  { %681 = vmatpush.msrb.mxu3 %v594_v36  ;;  %701 = vmatpush.msrb.mxu0 %v595_v37  ;;  %v599_v36 = vld [vmem:[%s2123_s15 + $0x1b0] sm:$0xff]  ;;  %v600_v37 = vld [vmem:[%s2123_s15 + $0x1b8] sm:$0xff] }
 0x161   :  { %682 = vmatpush.msrb.mxu3 %v587_v40  ;;  %702 = vmatpush.msrb.mxu0 %v588_v41  ;;  %v592_v40 = vld [vmem:[%s2123_s15 + $0x178] sm:$0xff]  ;;  %v593_v41 = vld [vmem:[%s2123_s15 + $0x180] sm:$0xff] }
 0x163   :  { %683 = vmatpush.msrb.mxu3 %v580_v44  ;;  %703 = vmatpush.msrb.mxu0 %v581_v45  ;;  %v585_v44 = vld [vmem:[%s2123_s15 + $0x140] sm:$0xff]  ;;  %v586_v45 = vld [vmem:[%s2123_s15 + $0x148] sm:$0xff] }
 0x164   :  { %v998_v34 = vpop.eup %997 }
 0x165   :  { %974 = vmatmul.msk.f32.vlgmr.msra.gmra.mxu0 %vm376_vm0, %v998_v34  ;;  %v603_v34 = vld [vmem:[%s2123_s15 + $0x1d0] sm:$0xff]  ;;  %684 = vmatpush.msrb.mxu3 %v573_v49 }
 0x166   :  { %720 = vmatpush.msrb.mxu1 %v603_v34  ;;  %v569_v34 = vld [vmem:[%s2123_s15 + $0xc0] sm:$0xff]  ;;  %v579_v49 = vld [vmem:[%s2123_s15 + $0x110] sm:$0xff] }
 0x168   :  { %721 = vmatpush.msrb.mxu1 %v596_v38  ;;  %v562_v38 = vld [vmem:[%s2123_s15 + $0x88] sm:$0xff] }
 0x16a   :  { %722 = vmatpush.msrb.mxu1 %v589_v42  ;;  %v555_v42 = vld [vmem:[%s2123_s15 + $0x50] sm:$0xff] }
 0x16c   :  { %723 = vmatpush.msrb.mxu1 %v582_v47  ;;  %v577_v47 = vld [vmem:[%s2123_s15 + $0x100] sm:$0xff] }
 0x16e   :  { %724 = vmatpush.msrb.mxu1 %v575_v51  ;;  %v571_v51 = vld [vmem:[%s2123_s15 + $0xd0] sm:$0xff] }
 0x1e2   :  { %v397_v50 = vpop.f32.mrf.mxu0 }
 0x1e3   :  { %v398_v52 = vadd.f32 %v990_v48, %v397_v50  ;;  %v625_v48 = vld [vmem:[%s2123_s15 + $0x280] sm:$0xff]  ;;  %v574_v50 = vld [vmem:[%s2123_s15 + $0xe8] sm:$0xff] }
 0x1e4   :  { %704 = vmatpush.msrb.mxu0 %v574_v50  ;;  %v570_v50 = vld [vmem:[%s2123_s15 + $0xc8] sm:$0xff] }
 0x1e5   :  { %999 = vtanh.f32 %v398_v52  ;;  %v618_v52 = vld [vmem:[%s2123_s15 + $0x248] sm:$0xff] }
 0x1e6   :  { %705 = vmatpush.msrb.mxu0 %v567_v55  ;;  %v565_v55 = vld [vmem:[%s2123_s15 + $0xa0] sm:$0xff] }
 0x1e8   :  { %706 = vmatpush.msrb.mxu0 %v560_v60  ;;  %v550_v60 = vld [vmem:[%s2123_s15 + $0x28] sm:$0xff] }
 0x1ea   :  { %707 = vmatpush.msrb.mxu0 %v553_v0 }
 0x1eb   :  { %v1000_v54 = vpop.eup %999 }
 0x1ec   :  { %976 = vmatmul.msk.f32.vlgmr.msra.gmra.mxu2 %vm407_vm2, %v1000_v54  ;;  %v566_v54 = vld [vmem:[%s2123_s15 + $0xa8] sm:$0xff] }
 0x1ed   :  { %733 = vmatpush.msra.mxu2 %v653_v33  ;;  %685 = vmatpush.msrb.mxu3 %v566_v54  ;;  %v607_v33 = vld [vmem:[%s2123_s15 + $0x1f0] sm:$0xff]  ;;  %v564_v54 = vld [vmem:[%s2123_s15 + $0x98] sm:$0xff] }
 0x1ef   :  { %734 = vmatpush.msra.mxu2 %v646_v35  ;;  %v598_v35 = vld [vmem:[%s2123_s15 + $0x1a8] sm:$0xff] }
 0x1f1   :  { %735 = vmatpush.msra.mxu2 %v639_v39  ;;  %v591_v39 = vld [vmem:[%s2123_s15 + $0x170] sm:$0xff] }
 0x1f3   :  { %736 = vmatpush.msra.mxu2 %v632_v43  ;;  %v584_v43 = vld [vmem:[%s2123_s15 + $0x138] sm:$0xff] }
 0x1f5   :  { %737 = vmatpush.msra.mxu2 %v625_v48  ;;  %v578_v48 = vld [vmem:[%s2123_s15 + $0x108] sm:$0xff] }
 0x1f7   :  { %738 = vmatpush.msra.mxu2 %v618_v52  ;;  %v572_v52 = vld [vmem:[%s2123_s15 + $0xd8] sm:$0xff] }
 0x26f   :  { %v432_v58 = vpop.f32.mrf.mxu2 }
 0x270   :  { %v433_v59 = vadd.f32 %v991_v57, %v432_v58  ;;  %v568_v57 = vld [vmem:[%s2123_s15 + $0xb8] sm:$0xff]  ;;  %v611_v58 = vld [vmem:[%s2123_s15 + $0x210] sm:$0xff] }
 0x271   :  { %725 = vmatpush.msrb.mxu1 %v568_v57  ;;  %739 = vmatpush.msra.mxu2 %v611_v58  ;;  %v557_v57 = vld [vmem:[%s2123_s15 + $0x60] sm:$0xff]  ;;  %v558_v58 = vld [vmem:[%s2123_s15 + $0x68] sm:$0xff] }
 0x272   :  { %946 = vst [vmem:[%s2125_s17] sm:$0xff] %v433_v59  ;;  %471 = vmatmul.f32.vlgmr.msrb.gmra.mxu2 %v433_v59  ;;  %v559_v59 = vld [vmem:[%s2123_s15 + $0x70] sm:$0xff] }
 0x273   :  { %686 = vmatpush.msrb.mxu3 %v559_v59  ;;  %726 = vmatpush.msrb.mxu1 %v561_v61  ;;  %v549_v59 = vld [vmem:[%s2123_s15 + $0x20] sm:$0xff]  ;;  %v551_v61 = vld [vmem:[%s2123_s15 + $0x30] sm:$0xff] }
 0x274   :  { %740 = vmatpush.msra.mxu2 %v604_v62  ;;  %v994_v62 = vld [vmem:[%s2122_s14] ss:$0 sm:$0xff]  ;;  %s1061_s14 = smov [#allocation2]  }
 0x275   :  { %687 = vmatpush.msrb.mxu3 %v552_v63 }
 0x2f5   :  { %v472_v2 = vpop.f32.mrf.mxu2 }
 0x2f6   :  { %v473_v3 = vadd.f32 %v992_v1, %v472_v2  ;;  %v554_v1 = vld [vmem:[%s2123_s15 + $0x48] sm:$0xff]  ;;  %v597_v2 = vld [vmem:[%s2123_s15 + $0x1a0] sm:$0xff] }
 0x2f7   :  { %727 = vmatpush.msrb.mxu1 %v554_v1  ;;  %741 = vmatpush.msra.mxu2 %v597_v2  ;;  %v657_v2 = vld [vmem:[%s2124_s16] sm:$0xff]  ;;  %s961_s16 = sshll.u32 %s1061_s14, 4  ;;  %s962_s16 = int_to_ptr.vmem [resolvable:$true] %s961_s16 }
 0x2f8   :  { %1001 = vtanh.f32 %v473_v3  ;;  %v545_v3 = vld [vmem:[%s2123_s15] sm:$0xff] }
 0x2f9   :  { %688 = vmatpush.msrb.mxu3 %v545_v3  ;;  %728 = vmatpush.msrb.mxu1 %v547_v6  ;;  %v660_v3 = vperm.slane %v657_v2, 1 }
 0x2fa   :  { %742 = vmatpush.msra.mxu2 %v590_v12  ;;  %v662_v12 = vperm.slane %v657_v2, 3 }
 0x2fc   :  { %743 = vmatpush.msra.mxu2 %v583_v16 }
 0x2fe   :  { %v1002_v4 = vpop.eup %1001  ;;  %744 = vmatpush.msra.mxu2 %v576_v30  ;;  %v663_v30 = vperm.slane %v657_v2, 4 }
 0x2ff   :  { %978 = vmatmul.msk.f32.vlgmr.msra.gmra.mxu3 %vm407_vm2, %v1002_v4  ;;  %v546_v4 = vld [vmem:[%s2123_s15 + $0x8] sm:$0xff] }
 0x300   :  { %708 = vmatpush.msrb.mxu0 %v546_v4  ;;  %753 = vmatpush.msra.mxu3 %v654_v5  ;;  %v661_v4 = vperm.slane %v657_v2, 2 }
 0x301   :  { %745 = vmatpush.msra.mxu2 %v569_v34 }
 0x302   :  { %773 = vmatpush.msra.mxu0 %v655_v7  ;;  %754 = vmatpush.msra.mxu3 %v647_v10  ;;  %v659_v10 = vperm.slane %v657_v2, 0 }
 0x303   :  { %746 = vmatpush.msra.mxu2 %v562_v38 }
 0x304   :  { %774 = vmatpush.msra.mxu0 %v648_v11  ;;  %755 = vmatpush.msra.mxu3 %v640_v14 }
 0x305   :  { %747 = vmatpush.msra.mxu2 %v555_v42 }
 0x306   :  { %775 = vmatpush.msra.mxu0 %v641_v15  ;;  %756 = vmatpush.msra.mxu3 %v633_v18  ;;  %v665_v15 = vperm.slane %v657_v2, 6 }
 0x308   :  { %776 = vmatpush.msra.mxu0 %v634_v19  ;;  %757 = vmatpush.msra.mxu3 %v626_v21 }
 0x30a   :  { %777 = vmatpush.msra.mxu0 %v627_v22  ;;  %758 = vmatpush.msra.mxu3 %v619_v24 }
 0x30c   :  { %778 = vmatpush.msra.mxu0 %v620_v25  ;;  %759 = vmatpush.msra.mxu3 %v612_v27 }
 0x30e   :  { %779 = vmatpush.msra.mxu0 %v613_v28  ;;  %760 = vmatpush.msra.mxu3 %v605_v31 }
 0x310   :  { %780 = vmatpush.msra.mxu0 %v606_v32  ;;  %761 = vmatpush.msra.mxu3 %v598_v35 }
 0x312   :  { %781 = vmatpush.msra.mxu0 %v599_v36  ;;  %762 = vmatpush.msra.mxu3 %v591_v39 }
 0x314   :  { %782 = vmatpush.msra.mxu0 %v592_v40  ;;  %763 = vmatpush.msra.mxu3 %v584_v43 }
 0x316   :  { %783 = vmatpush.msra.mxu0 %v585_v44  ;;  %764 = vmatpush.msra.mxu3 %v577_v47 }
 0x318   :  { %784 = vmatpush.msra.mxu0 %v578_v48  ;;  %765 = vmatpush.msra.mxu3 %v570_v50 }
 0x31a   :  { %785 = vmatpush.msra.mxu0 %v571_v51 }
 0x31c   :  { %786 = vmatpush.msra.mxu0 %v564_v54 }
 0x31e   :  { %787 = vmatpush.msra.mxu0 %v557_v57 }
 0x320   :  { %788 = vmatpush.msra.mxu0 %v550_v60 }
 0x382   :  { %v505_v53 = vpop.f32.mrf.mxu3 }
 0x383   :  { %v506_v56 = vadd.f32 %v993_v46, %v505_v53  ;;  %v548_v46 = vld [vmem:[%s2123_s15 + $0x18] sm:$0xff]  ;;  %v563_v53 = vld [vmem:[%s2123_s15 + $0x90] sm:$0xff] }
 0x384   :  { %748 = vmatpush.msra.mxu2 %v548_v46  ;;  %766 = vmatpush.msra.mxu3 %v563_v53 }
 0x385   :  { %1003 = vtanh.f32 %v506_v56  ;;  %v556_v56 = vld [vmem:[%s2123_s15 + $0x58] sm:$0xff] }
 0x386   :  { %767 = vmatpush.msra.mxu3 %v556_v56 }
 0x388   :  { %768 = vmatpush.msra.mxu3 %v549_v59 }
 0x38b   :  { %v1004_v8 = vpop.eup %1003 }
 0x38c   :  { %979 = vmatmul.msk.f32.vlgmr.msra.gmra.mxu1 %vm376_vm0, %v1004_v8 }
 0x38d   :  { %793 = vmatpush.msra.mxu1 %v656_v9 }
 0x38f   :  { %794 = vmatpush.msra.mxu1 %v649_v13  ;;  %v664_v13 = vperm.slane %v657_v2, 5 }
 0x391   :  { %795 = vmatpush.msra.mxu1 %v642_v17 }
 0x393   :  { %796 = vmatpush.msra.mxu1 %v635_v20 }
 0x395   :  { %797 = vmatpush.msra.mxu1 %v628_v23 }
 0x397   :  { %798 = vmatpush.msra.mxu1 %v621_v26 }
 0x399   :  { %799 = vmatpush.msra.mxu1 %v614_v29 }
 0x39b   :  { %800 = vmatpush.msra.mxu1 %v607_v33 }
 0x39d   :  { %801 = vmatpush.msra.mxu1 %v600_v37 }
 0x39f   :  { %802 = vmatpush.msra.mxu1 %v593_v41 }
 0x3a1   :  { %803 = vmatpush.msra.mxu1 %v586_v45 }
 0x3a3   :  { %804 = vmatpush.msra.mxu1 %v579_v49 }
 0x3a5   :  { %805 = vmatpush.msra.mxu1 %v572_v52 }
 0x3a7   :  { %806 = vmatpush.msra.mxu1 %v565_v55 }
 0x3a9   :  { %807 = vmatpush.msra.mxu1 %v558_v58 }
 0x3ab   :  { %808 = vmatpush.msra.mxu1 %v551_v61 }
 0x409   :  { %v541_v63 = vpop.f32.mrf.mxu1 }
 0x40a   :  { %v542_v0 = vadd.f32 %v994_v62, %v541_v63 }
 0x40c   :  { %1005 = vtanh.f32 %v542_v0 }
 0x412   :  { %v1006_v1 = vpop.eup %1005 }
 0x413   :  { %689 = vmatmul.f32.vlgmr.msrb.gmra.mxu3 %v1006_v1  ;;  %709 = vmatmul.f32.vlgmr.msrb.gmra.mxu0 %v1006_v1 }
 0x414   :  { %729 = vmatmul.f32.vlgmr.msrb.gmra.mxu1 %v1006_v1  ;;  %749 = vmatmul.f32.vlgmr.msra.gmra.mxu2 %v1006_v1 }
 0x41b   :  { %769 = vmatmul.f32.vlgmr.msra.gmra.mxu3 %v1006_v1  ;;  %789 = vmatmul.f32.vlgmr.msra.gmra.mxu0 %v1006_v1 }
 0x41c   :  { %809 = vmatmul.f32.vlgmr.msra.gmra.mxu1 %v1006_v1 }
 0x490   :  { %v710_v5 = vpop.f32.mrf.mxu0 }
 0x491   :  { %v711_v6 = vadd.f32 %v710_v5, %v660_v3  ;;  %v730_v7 = vpop.f32.mrf.mxu1 }
 0x492   :  { %v731_v8 = vadd.f32 %v730_v7, %v661_v4 }
 0x493   :  { %v981_v9 = vmul.f32 -1.442695, %v711_v6 }
 0x494   :  { %v982_v11 = vmul.f32 -1.442695, %v731_v8 }
 0x495   :  { %1007 = vpow2.f32 %v981_v9 }
 0x496   :  { %1009 = vpow2.f32 %v982_v11  ;;  %v690_v14 = vpop.f32.mrf.mxu3 }
 0x497   :  { %v691_v16 = vadd.f32 %v690_v14, %v659_v10  ;;  %v750_v17 = vpop.f32.mrf.mxu2 }
 0x498   :  { %v751_v18 = vadd.f32 %v750_v17, %v662_v12  ;;  %v790_v19 = vpop.f32.mrf.mxu0 }
 0x499   :  { %v980_v20 = vmul.f32 -1.442695, %v691_v16  ;;  %v791_v21 = vadd.f32 %v790_v19, %v664_v13  ;;  %v810_v22 = vpop.f32.mrf.mxu1 }
 0x49a   :  { %v983_v23 = vmul.f32 -1.442695, %v751_v18  ;;  %v811_v24 = vadd.f32 %v810_v22, %v665_v15 }
 0x49b   :  { %v1008_v25 = vpop.eup %1007  ;;  %1011 = vpow2.f32 %v980_v20  ;;  %v985_v26 = vmul.f32 -1.442695, %v791_v21 }
 0x49c   :  { %v1010_v27 = vpop.eup %1009  ;;  %v835_v28 = vadd.f32 1.0, %v1008_v25  ;;  %1013 = vpow2.f32 %v983_v23  ;;  %v986_v29 = vmul.f32 -1.442695, %v811_v24 }
 0x49d   :  { %v836_v31 = vadd.f32 1.0, %v1010_v27  ;;  %1015 = vpow2.f32 %v985_v26 }
 0x49e   :  { %1017 = vrcp.f32 %v835_v28  ;;  %v770_v32 = vpop.f32.mrf.mxu3  ;;  %v865_v40 = vand.u32 2147483647, %v835_v28  ;;  %v867_v44 = vand.u32 2147483648, %v835_v28  ;;  %vm861_vm3 = vweird.f32 %v835_v28 }
 0x49f   :  { %1019 = vrcp.f32 %v836_v31  ;;  %v771_v33 = vadd.f32 %v770_v32, %v663_v30  ;;  %v880_v47 = vand.u32 2147483647, %v836_v31  ;;  %v882_v48 = vand.u32 2147483648, %v836_v31 }
 0x4a0   :  { %1021 = vpow2.f32 %v986_v29  ;;  %vm876_vm4 = vweird.f32 %v836_v31  ;;  %vm2047_vm5 = vcmp.eq.f32.partialorder %v865_v40, 8.507059e+37  ;;  %v868_v55 = vor.u32 1.1754944e-38, %v867_v44 }
 0x4a1   :  { %v1012_v34 = vpop.eup %1011  ;;  %v984_v41 = vmul.f32 -1.442695, %v771_v33  ;;  %vm2054_vm8 = vcmp.eq.f32.partialorder %v880_v47, 8.507059e+37  ;;  %v883_v59 = vor.u32 1.1754944e-38, %v882_v48 }
 0x4a2   :  { %v1014_v35 = vpop.eup %1013  ;;  %v2039_v36 = vadd.f32 1.0, %v1012_v34 }
 0x4a3   :  { %v1016_v37 = vpop.eup %1015  ;;  %v2041_v38 = vadd.f32 1.0, %v1014_v35 }
 0x4a4   :  { %v1018_v39 = vpop.eup %1017  ;;  %1023 = vrcp.f32 %v2039_v36  ;;  %v2045_v50 = vadd.f32 1.0, %v1016_v37  ;;  %vm846_vm9 = vweird.f32 %v2039_v36  ;;  %v850_v0 = vand.u32 2147483647, %v2039_v36 }
 0x4a5   :  { %v1020_v42 = vpop.eup %1019  ;;  %v857_v43 = vmul.f32 %v1018_v39, %v835_v28  ;;  %1025 = vrcp.f32 %v2041_v38  ;;  %vm862_vm6 = vweird.f32 %v1018_v39  ;;  %v852_v1 = vand.u32 2147483648, %v2039_v36 }
 0x4a6   :  { %v1022_v45 = vpop.eup %1021  ;;  %v872_v46 = vmul.f32 %v1020_v42, %v836_v31  ;;  %1027 = vpow2.f32 %v984_v41  ;;  %vm877_vm7 = vweird.f32 %v1020_v42  ;;  %vm863_vm10 = vmor %vm861_vm3, %vm862_vm6  ;;  %vm891_vm12 = vweird.f32 %v2041_v38 }
 0x4a7   :  { %v858_v49 = vsub.f32 1.0, %v857_v43  ;;  %v2051_v53 = vadd.f32 1.0, %v1022_v45  ;;  %1029 = vrcp.f32 %v2045_v50  ;;  %vm878_vm11 = vmor %vm876_vm4, %vm877_vm7  ;;  %v895_v5 = vand.u32 2147483647, %v2041_v38 }
 0x4a8   :  { %v873_v52 = vsub.f32 1.0, %v872_v46  ;;  %v897_v10 = vand.u32 2147483648, %v2041_v38  ;;  %vm2075_vm14 = vcmp.eq.f32.partialorder %v850_v0, 8.507059e+37  ;;  %v853_v20 = vor.u32 1.1754944e-38, %v852_v1 }
 0x4a9   :  { %v859_v54 = vmul.f32 %v1018_v39, %v858_v49  ;;  %1031 = vrcp.f32 %v2051_v53  ;;  %vm2080_vm0 = vcmp.eq.f32.partialorder %v895_v5, 8.507059e+37  ;;  %v925_v27 = vand.u32 2147483647, %v2045_v50 }
 0x4aa   :  { %v1024_v56 = vpop.eup %1023  ;;  %v874_v57 = vmul.f32 %v1020_v42, %v873_v52  ;;  %v898_v23 = vor.u32 1.1754944e-38, %v897_v10  ;;  %v927_v28 = vand.u32 2147483648, %v2045_v50  ;;  %vm921_vm4 = vweird.f32 %v2045_v50 }
 0x4ab   :  { %v1026_v60 = vpop.eup %1025  ;;  %v860_v61 = vadd.f32 %v1018_v39, %v859_v54  ;;  %v842_v62 = vmul.f32 %v1024_v56, %v2039_v36  ;;  %vm847_vm13 = vweird.f32 %v1024_v56  ;;  %v942_v34 = vand.u32 2147483648, %v2051_v53 }
 0x4ac   :  { %v875_v63 = vadd.f32 %v1020_v42, %v874_v57  ;;  %v887_v2 = vmul.f32 %v1026_v60, %v2041_v38  ;;  %v1028_v6 = vpop.eup %1027  ;;  %vm892_vm15 = vweird.f32 %v1026_v60  ;;  %vm848_vm1 = vmor %vm846_vm9, %vm847_vm13  ;;  %v940_v37 = vand.u32 2147483647, %v2051_v53 }
 0x4ad   :  { %v864_v3 = vsel %vm863_vm10, %v1018_v39, %v860_v61  ;;  %v843_v4 = vsub.f32 1.0, %v842_v62  ;;  %v1030_v11 = vpop.eup %1029  ;;  %v2073_v14 = vadd.f32 1.0, %v1028_v6  ;;  %vm893_vm2 = vmor %vm891_vm12, %vm892_vm15  ;;  %vm926_vm7 = vcmp.eq.f32.partialorder %v925_v27, 8.507059e+37 }
 0x4ae   :  { %v869_v7 = vsel %vm2047_vm5, %v868_v55, %v864_v3  ;;  %v879_v8 = vsel %vm878_vm11, %v1020_v42, %v875_v63  ;;  %v888_v9 = vsub.f32 1.0, %v887_v2  ;;  %v917_v17 = vmul.f32 %v1030_v11, %v2045_v50 }
 0x4af   :  { %948 = vst [vmem:[#allocation2 + $0x8] sm:$0xff] %v869_v7  ;;  %v884_v12 = vsel %vm2054_vm8, %v883_v59, %v879_v8  ;;  %v844_v13 = vmul.f32 %v1024_v56, %v843_v4  ;;  %v1032_v18 = vpop.eup %1031  ;;  %1033 = vrcp.f32 %v2073_v14  ;;  %vm922_vm3 = vweird.f32 %v1030_v11 }
 0x4b0   :  { %949 = vst [vmem:[#allocation2 + $0x10] sm:$0xff] %v884_v12  ;;  %v889_v16 = vmul.f32 %v1026_v60, %v888_v9  ;;  %v918_v24 = vsub.f32 1.0, %v917_v17  ;;  %v932_v25 = vmul.f32 %v1032_v18, %v2051_v53  ;;  %vm937_vm5 = vweird.f32 %v1032_v18  ;;  %vm923_vm6 = vmor %vm921_vm4, %vm922_vm3 }
 0x4b1   :  { %v845_v19 = vadd.f32 %v1024_v56, %v844_v13  ;;  %v928_v39 = vor.u32 1.1754944e-38, %v927_v28  ;;  %vm936_vm8 = vweird.f32 %v2051_v53  ;;  %v943_v44 = vor.u32 1.1754944e-38, %v942_v34 }
 0x4b2   :  { %v890_v22 = vadd.f32 %v1026_v60, %v889_v16  ;;  %v919_v31 = vmul.f32 %v1030_v11, %v918_v24  ;;  %v933_v32 = vsub.f32 1.0, %v932_v25  ;;  %vm938_vm9 = vmor %vm936_vm8, %vm937_vm5  ;;  %vm941_vm10 = vcmp.eq.f32.partialorder %v940_v37, 8.507059e+37 }
 0x4b3   :  { %v849_v26 = vsel %vm848_vm1, %v1024_v56, %v845_v19  ;;  %v912_v48 = vand.u32 2147483648, %v2073_v14  ;;  %v910_v50 = vand.u32 2147483647, %v2073_v14  ;;  %vm906_vm12 = vweird.f32 %v2073_v14 }
 0x4b4   :  { %v854_v29 = vsel %vm2075_vm14, %v853_v20, %v849_v26  ;;  %v894_v30 = vsel %vm893_vm2, %v1026_v60, %v890_v22  ;;  %v920_v35 = vadd.f32 %v1030_v11, %v919_v31  ;;  %v934_v36 = vmul.f32 %v1032_v18, %v933_v32 }
 0x4b5   :  { %947 = vst [vmem:[#allocation2] sm:$0xff] %v854_v29  ;;  %v899_v33 = vsel %vm2080_vm0, %v898_v23, %v894_v30  ;;  %v1034_v38 = vpop.eup %1033  ;;  %v913_v52 = vor.u32 1.1754944e-38, %v912_v48  ;;  %vm911_vm14 = vcmp.eq.f32.partialorder %v910_v50, 8.507059e+37 }
 0x4b6   :  { %950 = vst [vmem:[#allocation2 + $0x18] sm:$0xff] %v899_v33  ;;  %v924_v40 = vsel %vm923_vm6, %v1030_v11, %v920_v35  ;;  %v935_v41 = vadd.f32 %v1032_v18, %v934_v36  ;;  %v902_v42 = vmul.f32 %v1034_v38, %v2073_v14  ;;  %vm907_vm11 = vweird.f32 %v1034_v38 }
 0x4b7   :  { %v929_v43 = vsel %vm926_vm7, %v928_v39, %v924_v40  ;;  %vm908_vm13 = vmor %vm906_vm12, %vm907_vm11 }
 0x4b8   :  { %952 = vst [vmem:[#allocation2 + $0x28] sm:$0xff] %v929_v43  ;;  %v939_v45 = vsel %vm938_vm9, %v1032_v18, %v935_v41  ;;  %v903_v46 = vsub.f32 1.0, %v902_v42 }
 0x4b9   :  { %v944_v47 = vsel %vm941_vm10, %v943_v44, %v939_v45 }
 0x4ba   :  { %953 = vst [vmem:[#allocation2 + $0x30] sm:$0xff] %v944_v47  ;;  %v904_v49 = vmul.f32 %v1034_v38, %v903_v46 }
 0x4bc   :  { %v905_v51 = vadd.f32 %v1034_v38, %v904_v49 }
 0x4be   :  { %v909_v53 = vsel %vm908_vm13, %v1034_v38, %v905_v51 }
 0x4bf   :  { %v914_v54 = vsel %vm911_vm14, %v913_v52, %v909_v53 }
 0x4c0   :  { %951 = vst [vmem:[#allocation2 + $0x20] sm:$0xff] %v914_v54 }
 0x4c1   :  { %966 = dma.vmem_to_hbm [thread:$0]  %s962_s16, 896, %s964_s7, [#allocation3]  }
 0x4c2   :  { %1059 = dma.done.wait [#allocation3], 896  }
 0x4c3   :  { %1060 = vsyncadd [#allocation3], 4294966400 }
 0x4c4   :  { %973 = vsyncpa [#allocation3], 1 }

</bundles_post_ra>
